<compile_context>
chip_gen: v5e
topology: v5e:2x2
jax: 0.10.0
libtpu: 0.0.40
codegen_flags: <defaults>
</compile_context>

<pallas_src>
import functools
import math

import jax
import jax.numpy as jnp
from jax import lax
from jax.experimental import pallas as pl
from jax.experimental.pallas import tpu as pltpu


# ----------------------------------------------------------------------------
# Kernel: full encoder stack; grid = (batch, layer)
# ----------------------------------------------------------------------------
def _encoder_stack_kernel(x_ref, pos_ref, mask_ref,
                          wqkv_ref, bqkv_ref, wo_ref, bo_ref,
                          ln1g_ref, ln1b_ref,
                          w1_ref, b1_ref, w2_ref, b2_ref,
                          ln2g_ref, ln2b_ref,
                          *out_and_scratch,
                          n_heads, eps, embed_scale, save_attn):
    if save_attn:
        xo_ref, attn_ref, xs_ref, ctx_ref = out_and_scratch
    else:
        xo_ref, xs_ref, ctx_ref = out_and_scratch
        attn_ref = None

    layer = pl.program_id(1)
    n_layers = pl.num_programs(1)

    # Layer 0: initialize the resident activation from the embedded input
    # (fused sqrt(d_model)*tok_emb + pos_emb; dropout == identity in eval).
    @pl.when(layer == 0)
    def _():
        xs_ref[...] = embed_scale * x_ref[0] + pos_ref[...]

    x = xs_ref[...]                                     # (S, D) f32
    S, D = x.shape
    hd = D // n_heads

    # ---- fused QKV projection: one MXU pass, N = 3*D (bf16 in, f32 acc) ----
    xb = x.astype(jnp.bfloat16)
    qkv = jnp.dot(xb, wqkv_ref[0], preferred_element_type=jnp.float32)
    qkv = qkv + bqkv_ref[0]

    masked = mask_ref[0] != 0                           # (1, S) key-pad mask

    # ---- per-head attention; contexts written into column blocks of ctx ----
    for h in range(n_heads):
        q_h = qkv[:, h * hd:(h + 1) * hd].astype(jnp.bfloat16)       # scale in W_q
        k_h = qkv[:, D + h * hd:D + (h + 1) * hd].astype(jnp.bfloat16)
        v_h = qkv[:, 2 * D + h * hd:2 * D + (h + 1) * hd].astype(jnp.bfloat16)
        sc = lax.dot_general(q_h, k_h, (((1,), (1,)), ((), ())),
                             preferred_element_type=jnp.float32)     # (S, S)
        # PyTorch: attention_score[mask] = 1e-10 (value assignment, not -inf).
        sc = jnp.where(masked, 1e-10, sc)
        sc = sc - jnp.max(sc, axis=-1, keepdims=True)
        p = jnp.exp(sc)
        w = p * pl.reciprocal(jnp.sum(p, axis=-1, keepdims=True), approx=True)
        if save_attn:
            attn_ref[0, 0, h, :, :] = w
        ctx_ref[:, h * hd:(h + 1) * hd] = jnp.dot(
            w.astype(jnp.bfloat16), v_h,
            preferred_element_type=jnp.float32).astype(jnp.bfloat16)

    # ---- single K=D output projection (head concat folded into ctx scratch) ----
    attn_out = jnp.dot(ctx_ref[...], wo_ref[0],
                       preferred_element_type=jnp.float32) + bo_ref[0]

    # ---- residual + LayerNorm 1 ----
    h1 = x + attn_out
    mu = jnp.mean(h1, axis=-1, keepdims=True)
    var = jnp.mean((h1 - mu) ** 2, axis=-1, keepdims=True)
    h1 = (h1 - mu) * lax.rsqrt(var + eps) * ln1g_ref[0] + ln1b_ref[0]

    # ---- FeedForward: Linear -> ReLU -> (Dropout=id) -> Linear ----
    f = jnp.dot(h1.astype(jnp.bfloat16), w1_ref[0],
                preferred_element_type=jnp.float32) + b1_ref[0]
    f = jnp.maximum(f, 0.0)
    f = jnp.dot(f.astype(jnp.bfloat16), w2_ref[0],
                preferred_element_type=jnp.float32) + b2_ref[0]

    # ---- residual + LayerNorm 2 ----
    h2 = h1 + f
    mu2 = jnp.mean(h2, axis=-1, keepdims=True)
    var2 = jnp.mean((h2 - mu2) ** 2, axis=-1, keepdims=True)
    xnew = (h2 - mu2) * lax.rsqrt(var2 + eps) * ln2g_ref[0] + ln2b_ref[0]

    xs_ref[...] = xnew                                  # stays resident for l+1

    @pl.when(layer == n_layers - 1)
    def _():
        xo_ref[0] = xnew


# ----------------------------------------------------------------------------
# VMEM budget (clamped to the actual per-core capacity)
# ----------------------------------------------------------------------------
def _vmem_budget(S, D, d_ff, H, save_attn):
    f32, bf16 = 4, 2
    act = S * D
    w_layer = ((D * 3 * D + D * D + D * d_ff + d_ff * D) * bf16
               + (3 * D + 6 * D + d_ff) * f32)
    need = 0
    need += 2 * act * f32                    # x input block (double-buffered)
    need += 2 * act * f32                    # pos
    need += 2 * S * 4                        # key-pad mask
    need += 2 * w_layer                      # layer weights (next layer prefetched)
    need += 2 * act * f32                    # x output block
    if save_attn:
        need += 2 * H * S * S * f32          # streamed attention-map block
    need += act * (f32 + bf16)               # xs + ctx scratch
    need += 3 * act * f32 + 3 * act * bf16   # qkv + per-head bf16 slices
    need += 4 * S * S * f32                  # scores / exp / weights
    need += S * d_ff * f32 + 4 * act * f32   # FF hidden + misc f32 temps
    need += 4 << 20                          # margin

    cap = 64 << 20                           # conservative default (v7x)
    try:
        info = pltpu.get_tpu_info()
        cap = int(getattr(info, "vmem_capacity_bytes", cap) or cap)
    except Exception:
        pass
    return int(min(max(need, 32 << 20), cap - (2 << 20)))


# ----------------------------------------------------------------------------
# pallas_call wrapper for the fused stack
# ----------------------------------------------------------------------------
def encoder_stack(x, pos, mask, wp, *, n_heads, embed_scale, save_attn):
    B, S, D = x.shape
    L = wp["wqkv"].shape[0]
    H = n_heads
    d_ff = wp["w1"].shape[-1]

    kernel = functools.partial(
        _encoder_stack_kernel,
        n_heads=n_heads, eps=1e-5, embed_scale=embed_scale, save_attn=save_attn)

    def batch_spec(shape):      # per-batch block, constant across the layer axis
        nd = len(shape)
        return pl.BlockSpec((1,) + tuple(shape[1:]),
                            lambda b, l: (b,) + (0,) * (nd - 1))

    def layer_spec(shape):      # per-layer weight block (layer l+1 auto-prefetched)
        nd = len(shape)
        return pl.BlockSpec((1,) + tuple(shape[1:]),
                            lambda b, l: (l,) + (0,) * (nd - 1))

    in_specs = [
        batch_spec(x.shape),                              # x (B, S, D)
        pl.BlockSpec((S, D), lambda b, l: (0, 0)),        # pos (resident)
        batch_spec(mask.shape),                           # key-pad mask (B, 1, S)
    ]
    operands = [x, pos, mask]
    weight_names = ["wqkv", "bqkv", "wo", "bo", "ln1_g", "ln1_b",
                    "w1", "b1", "w2", "b2", "ln2_g", "ln2_b"]
    for name in weight_names:
        a = wp[name]
        in_specs.append(layer_spec(a.shape))
        operands.append(a)

    if save_attn:
        out_shape = (jax.ShapeDtypeStruct((B, S, D), jnp.float32),
                     jax.ShapeDtypeStruct((B, L, H, S, S), jnp.float32))
        out_specs = (pl.BlockSpec((1, S, D), lambda b, l: (b, 0, 0)),
                     # per-(batch, layer) block -> every grid step writes its own
                     # block; batch 0 is sliced outside, batch axis stays parallel.
                     pl.BlockSpec((1, 1, H, S, S), lambda b, l: (b, l, 0, 0, 0)))
    else:
        out_shape = jax.ShapeDtypeStruct((B, S, D), jnp.float32)
        out_specs = pl.BlockSpec((1, S, D), lambda b, l: (b, 0, 0))

    return pl.pallas_call(
        kernel,
        out_shape=out_shape,
        grid=(B, L),
        in_specs=in_specs,
        out_specs=out_specs,
        scratch_shapes=[pltpu.VMEM((S, D), jnp.float32),      # resident activation
                        pltpu.VMEM((S, D), jnp.bfloat16)],    # per-head context
        compiler_params=pltpu.CompilerParams(
            dimension_semantics=("parallel", "arbitrary"),
            vmem_limit_bytes=_vmem_budget(S, D, d_ff, H, save_attn)),
    )(*operands)


# ----------------------------------------------------------------------------
# One-time parameter prep (outside jit): stack layers, fuse QKV, fold the
# attention scale into W_q / b_q, cast matmul weights to bf16.
# ----------------------------------------------------------------------------
def prepare_params(params, n_heads):
    D = params["tok_emb"].shape[1]
    inv_scale = 1.0 / math.sqrt(D / n_heads)

    def stack(fn, dtype=None):
        a = jnp.stack([fn(p) for p in params["layers"]], axis=0)
        return a.astype(dtype) if dtype is not None else a

    return {
        "tok_emb": params["tok_emb"],
        "pos_emb": params["pos_emb"],
        "wqkv": stack(lambda p: jnp.concatenate(
            [p["wq"] * inv_scale, p["wk"], p["wv"]], axis=1), jnp.bfloat16),
        "bqkv": stack(lambda p: jnp.concatenate(
            [p["bq"] * inv_scale, p["bk"], p["bv"]], axis=1)),
        "wo": stack(lambda p: p["wo"], jnp.bfloat16),
        "bo": stack(lambda p: p["bo"]),
        "ln1_g": stack(lambda p: p["ln1_g"]), "ln1_b": stack(lambda p: p["ln1_b"]),
        "w1": stack(lambda p: p["w1"], jnp.bfloat16), "b1": stack(lambda p: p["b1"]),
        "w2": stack(lambda p: p["w2"], jnp.bfloat16), "b2": stack(lambda p: p["b2"]),
        "ln2_g": stack(lambda p: p["ln2_g"]), "ln2_b": stack(lambda p: p["ln2_b"]),
    }


# ----------------------------------------------------------------------------
# Encoder forward (glue: embedding gather + single fused pallas_call)
# ----------------------------------------------------------------------------
def encoder_forward(src, key_mask, prepped, *, n_heads, atten_map_save=True):
    B, S = src.shape
    D = prepped["tok_emb"].shape[1]
    # Embedding gather stays in XLA (data-dependent gather); the sqrt(D) scale
    # and positional add are fused into the l==0 step of the kernel.
    tok = jnp.take(prepped["tok_emb"], src, axis=0)              # (B, S, D)
    pos = prepped["pos_emb"][:S]                                 # (S, D)
    mask = key_mask.reshape(B, 1, S).astype(jnp.int32)           # key-pad mask
    embed_scale = math.sqrt(D)

    res = encoder_stack(tok, pos, mask, prepped,
                        n_heads=n_heads, embed_scale=embed_scale,
                        save_attn=atten_map_save)
    if atten_map_save:
        x_out, attn_all = res                                    # (B, L, H, S, S)
        return x_out, attn_all[0]                                # batch 0, like PyTorch
    return res, jnp.zeros((0,), jnp.float32)


# ----------------------------------------------------------------------------
# Deterministic parameter initialization
# ----------------------------------------------------------------------------
def init_params(key, vocab, max_len, n_layers, d_model, d_ff):
    def nrm(k, shape, scale=0.02):
        return (scale * jax.random.normal(k, shape)).astype(jnp.float32)

    keys = jax.random.split(key, 2 + n_layers)
    params = {
        "tok_emb": nrm(keys[0], (vocab, d_model), 1.0),
        "pos_emb": nrm(keys[1], (max_len, d_model), 1.0),
        "layers": [],
    }
    for li in range(n_layers):
        ks = jax.random.split(keys[2 + li], 8)
        params["layers"].append({
            "wq": nrm(ks[0], (d_model, d_model)), "bq": jnp.zeros((1, d_model), jnp.float32),
            "wk": nrm(ks[1], (d_model, d_model)), "bk": jnp.zeros((1, d_model), jnp.float32),
            "wv": nrm(ks[2], (d_model, d_model)), "bv": jnp.zeros((1, d_model), jnp.float32),
            "wo": nrm(ks[3], (d_model, d_model)), "bo": jnp.zeros((1, d_model), jnp.float32),
            "ln1_g": jnp.ones((1, d_model), jnp.float32),
            "ln1_b": jnp.zeros((1, d_model), jnp.float32),
            "w1": nrm(ks[4], (d_model, d_ff)), "b1": jnp.zeros((1, d_ff), jnp.float32),
            "w2": nrm(ks[5], (d_ff, d_model)), "b2": jnp.zeros((1, d_model), jnp.float32),
            "ln2_g": jnp.ones((1, d_model), jnp.float32),
            "ln2_b": jnp.zeros((1, d_model), jnp.float32),
        })
    return params


# ----------------------------------------------------------------------------
# Pure-JAX f32 reference (kernel uses bf16 MXU inputs -> looser tolerance)
# ----------------------------------------------------------------------------
def reference_forward(src, key_mask, params, n_heads):
    D = params["tok_emb"].shape[1]
    S = src.shape[1]
    x = math.sqrt(D) * params["tok_emb"][src] + params["pos_emb"][:S]
    mask4 = key_mask[:, None, None, :]
    attn_maps = []
    for p in params["layers"]:
        q = x @ p["wq"] + p["bq"]
        k = x @ p["wk"] + p["bk"]
        v = x @ p["wv"] + p["bv"]
        B = x.shape[0]
        hd = D // n_heads
        qh = q.reshape(B, S, n_heads, hd).transpose(0, 2, 1, 3)
        kh = k.reshape(B, S, n_heads, hd).transpose(0, 2, 1, 3)
        vh = v.reshape(B, S, n_heads, hd).transpose(0, 2, 1, 3)
        sc = jnp.einsum("bhqd,bhkd->bhqk", qh, kh) / math.sqrt(D / n_heads)
        sc = jnp.where(mask4, 1e-10, sc)
        w = jax.nn.softmax(sc, axis=-1)
        attn_maps.append(w[0])
        ctx = jnp.einsum("bhqk,bhkd->bhqd", w, vh).transpose(0, 2, 1, 3).reshape(B, S, D)
        res = ctx @ p["wo"] + p["bo"]
        h = x + res
        mu = h.mean(-1, keepdims=True)
        var = ((h - mu) ** 2).mean(-1, keepdims=True)
        h = (h - mu) / jnp.sqrt(var + 1e-5) * p["ln1_g"] + p["ln1_b"]
        f = jnp.maximum(h @ p["w1"] + p["b1"], 0.0) @ p["w2"] + p["b2"]
        y = h + f
        mu2 = y.mean(-1, keepdims=True)
        var2 = ((y - mu2) ** 2).mean(-1, keepdims=True)
        x = (y - mu2) / jnp.sqrt(var2 + 1e-5) * p["ln2_g"] + p["ln2_b"]
    return x, jnp.stack(attn_maps, axis=0)


if __name__ == "__main__":
    B, S, D, d_ff, H, n_layers = 2, 8, 32, 64, 4, 2
    vocab, max_len = 50, 16

    key = jax.random.PRNGKey(0)
    kp, ks = jax.random.split(key, 2)
    params = init_params(kp, vocab, max_len, n_layers, D, d_ff)
    prepped = prepare_params(params, H)      # once, at parameter-load time

    src = jax.random.randint(ks, (B, S), 0, vocab, dtype=jnp.int32)
    # key-padding mask: True => masked key position (last 2 keys masked)
    key_valid = jnp.arange(S) < 6
    key_mask = jnp.broadcast_to(~key_valid, (B, S))

    fwd_with_maps = jax.jit(functools.partial(
        encoder_forward, n_heads=H, atten_map_save=True))
    fwd_fast = jax.jit(functools.partial(
        encoder_forward, n_heads=H, atten_map_save=False))

    x_out, attn_encs = fwd_with_maps(src, key_mask, prepped)
    x_out = jax.block_until_ready(x_out)
    attn_encs = jax.block_until_ready(attn_encs)

    assert x_out.shape == (B, S, D)
    assert attn_encs.shape == (n_layers, H, S, S)

    x_ref, attn_ref_maps = reference_forward(src, key_mask, params, H)
    err_x = float(jnp.max(jnp.abs(x_out - x_ref)))
    err_a = float(jnp.max(jnp.abs(attn_encs - attn_ref_maps)))
    # bf16 MXU inputs (f32 accumulation) -> looser tolerance than pure f32.
    assert err_x < 2e-2, f"x mismatch vs reference: {err_x}"
    assert err_a < 2e-2, f"attn-map mismatch vs reference: {err_a}"

    # Fast path: no attention-map output materialized at all.
    x_fast, _ = fwd_fast(src, key_mask, prepped)
    x_fast = jax.block_until_ready(x_fast)
    assert x_fast.shape == (B, S, D)
    assert float(jnp.max(jnp.abs(x_fast - x_out))) < 1e-3

    print("KERNEL_OK")
</pallas_src>

<mosaic_0001>
module attributes {stable_mosaic.version = 11 : i64} {
  func.func @_encoder_stack_kernel(%arg0: i32, %arg1: i32, %arg2: memref<1x8x32xf32, #tpu.memory_space<vmem>>, %arg3: memref<8x32xf32, #tpu.memory_space<vmem>>, %arg4: memref<1x1x8xi32, #tpu.memory_space<vmem>>, %arg5: memref<1x32x96xbf16, #tpu.memory_space<vmem>>, %arg6: memref<1x1x96xf32, #tpu.memory_space<vmem>>, %arg7: memref<1x32x32xbf16, #tpu.memory_space<vmem>>, %arg8: memref<1x1x32xf32, #tpu.memory_space<vmem>>, %arg9: memref<1x1x32xf32, #tpu.memory_space<vmem>>, %arg10: memref<1x1x32xf32, #tpu.memory_space<vmem>>, %arg11: memref<1x32x64xbf16, #tpu.memory_space<vmem>>, %arg12: memref<1x1x64xf32, #tpu.memory_space<vmem>>, %arg13: memref<1x64x32xbf16, #tpu.memory_space<vmem>>, %arg14: memref<1x1x32xf32, #tpu.memory_space<vmem>>, %arg15: memref<1x1x32xf32, #tpu.memory_space<vmem>>, %arg16: memref<1x1x32xf32, #tpu.memory_space<vmem>>, %arg17: memref<1x8x32xf32, #tpu.memory_space<vmem>>, %arg18: memref<1x1x4x8x8xf32, #tpu.memory_space<vmem>>, %arg19: memref<8x32xf32, #tpu.memory_space<vmem>>, %arg20: memref<8x32xbf16, #tpu.memory_space<vmem>>) attributes {dimension_semantics = [#tpu.dimension_semantics<parallel>, #tpu.dimension_semantics<arbitrary>], iteration_bounds = array<i64: 2, 2>, scalar_prefetch = 0 : i64, scratch_operands = 2 : i64, tpu.core_type = #tpu.core_type<tc>, window_params = [{transform_indices = @transform_0, window_bounds = array<i64: 1, 8, 32>}, {pipeline_mode = #tpu.pipeline_mode<synchronous>, transform_indices = @transform_1, window_bounds = array<i64: 8, 32>}, {transform_indices = @transform_2, window_bounds = array<i64: 1, 1, 8>}, {transform_indices = @transform_3, window_bounds = array<i64: 1, 32, 96>}, {transform_indices = @transform_4, window_bounds = array<i64: 1, 1, 96>}, {transform_indices = @transform_5, window_bounds = array<i64: 1, 32, 32>}, {transform_indices = @transform_6, window_bounds = array<i64: 1, 1, 32>}, {transform_indices = @transform_7, window_bounds = array<i64: 1, 1, 32>}, {transform_indices = @transform_8, window_bounds = array<i64: 1, 1, 32>}, {transform_indices = @transform_9, window_bounds = array<i64: 1, 32, 64>}, {transform_indices = @transform_10, window_bounds = array<i64: 1, 1, 64>}, {transform_indices = @transform_11, window_bounds = array<i64: 1, 64, 32>}, {transform_indices = @transform_12, window_bounds = array<i64: 1, 1, 32>}, {transform_indices = @transform_13, window_bounds = array<i64: 1, 1, 32>}, {transform_indices = @transform_14, window_bounds = array<i64: 1, 1, 32>}, {transform_indices = @transform_15, window_bounds = array<i64: 1, 8, 32>}, {transform_indices = @transform_16, window_bounds = array<i64: 1, 1, 4, 8, 8>}]} {
    %c0_i32 = arith.constant 0 : i32
    %0 = arith.cmpi eq, %arg1, %c0_i32 : i32
    %1 = arith.extui %0 : i1 to i32
    %c0_i32_0 = arith.constant 0 : i32
    %2 = arith.cmpi ne, %1, %c0_i32_0 : i32
    scf.if %2 {
      %c0_103 = arith.constant 0 : index
      %c0_104 = arith.constant 0 : index
      %c0_105 = arith.constant 0 : index
      %212 = vector.load %arg2[%c0_103, %c0_104, %c0_105] : memref<1x8x32xf32, #tpu.memory_space<vmem>>, vector<1x8x32xf32>
      %213 = vector.shape_cast %212 : vector<1x8x32xf32> to vector<8x32xf32>
      %cst_106 = arith.constant 5.65685415 : f32
      %214 = vector.broadcast %cst_106 : f32 to vector<8x32xf32>
      %215 = arith.mulf %214, %213 : vector<8x32xf32>
      %c0_107 = arith.constant 0 : index
      %c0_108 = arith.constant 0 : index
      %216 = vector.load %arg3[%c0_107, %c0_108] : memref<8x32xf32, #tpu.memory_space<vmem>>, vector<8x32xf32>
      %217 = arith.addf %215, %216 : vector<8x32xf32>
      %c0_109 = arith.constant 0 : index
      %c0_110 = arith.constant 0 : index
      %218 = vector.load %arg19[%c0_109, %c0_110] : memref<8x32xf32, #tpu.memory_space<vmem>>, vector<8x32xf32>
      tpu.vector_store %arg19[%c0_109, %c0_110], %217 {strides = array<i32>} : memref<8x32xf32, #tpu.memory_space<vmem>>, vector<8x32xf32>,
    } else {
    }
    %c0 = arith.constant 0 : index
    %c0_1 = arith.constant 0 : index
    %3 = vector.load %arg19[%c0, %c0_1] : memref<8x32xf32, #tpu.memory_space<vmem>>, vector<8x32xf32>
    %4 = arith.truncf %3 : vector<8x32xf32> to vector<8x32xbf16>
    %c0_2 = arith.constant 0 : index
    %c0_3 = arith.constant 0 : index
    %c0_4 = arith.constant 0 : index
    %5 = vector.load %arg5[%c0_2, %c0_3, %c0_4] : memref<1x32x96xbf16, #tpu.memory_space<vmem>>, vector<1x32x96xbf16>
    %6 = vector.shape_cast %5 : vector<1x32x96xbf16> to vector<32x96xbf16>
    %cst = arith.constant dense<0.000000e+00> : vector<8x96xf32>
    %7 = tpu.matmul %4, %6, %cst {dimension_numbers = #tpu.dot_dimension_numbers<[1], [0], [0], [1], [0, 0, 1, 1], [], []>} : vector<8x32xbf16>, vector<32x96xbf16>, vector<8x96xf32> -> vector<8x96xf32>
    %c0_5 = arith.constant 0 : index
    %c0_6 = arith.constant 0 : index
    %c0_7 = arith.constant 0 : index
    %8 = vector.load %arg6[%c0_5, %c0_6, %c0_7] : memref<1x1x96xf32, #tpu.memory_space<vmem>>, vector<1x1x96xf32>
    %9 = vector.shape_cast %8 : vector<1x1x96xf32> to vector<1x96xf32>
    %10 = vector.broadcast %9 : vector<1x96xf32> to vector<8x96xf32>
    %11 = arith.addf %7, %10 : vector<8x96xf32>
    %c0_8 = arith.constant 0 : index
    %c0_9 = arith.constant 0 : index
    %c0_10 = arith.constant 0 : index
    %12 = vector.load %arg4[%c0_8, %c0_9, %c0_10] : memref<1x1x8xi32, #tpu.memory_space<vmem>>, vector<1x1x8xi32>
    %13 = vector.shape_cast %12 : vector<1x1x8xi32> to vector<1x8xi32>
    %c0_i32_11 = arith.constant 0 : i32
    %14 = vector.broadcast %c0_i32_11 : i32 to vector<1x8xi32>
    %15 = arith.cmpi ne, %13, %14 : vector<1x8xi32>
    %16 = vector.extract_strided_slice %11 {offsets = [0, 0], sizes = [8, 8], strides = [1, 1]} : vector<8x96xf32> to vector<8x8xf32>
    %17 = arith.truncf %16 : vector<8x8xf32> to vector<8x8xbf16>
    %18 = vector.extract_strided_slice %11 {offsets = [0, 32], sizes = [8, 8], strides = [1, 1]} : vector<8x96xf32> to vector<8x8xf32>
    %19 = arith.truncf %18 : vector<8x8xf32> to vector<8x8xbf16>
    %20 = vector.extract_strided_slice %11 {offsets = [0, 64], sizes = [8, 8], strides = [1, 1]} : vector<8x96xf32> to vector<8x8xf32>
    %21 = arith.truncf %20 : vector<8x8xf32> to vector<8x8xbf16>
    %cst_12 = arith.constant dense<0.000000e+00> : vector<8x8xf32>
    %22 = tpu.matmul %17, %19, %cst_12 {dimension_numbers = #tpu.dot_dimension_numbers<[1], [1], [0], [0], [0, 0, 1, 0], [], []>} : vector<8x8xbf16>, vector<8x8xbf16>, vector<8x8xf32> -> vector<8x8xf32>
    %cst_13 = arith.constant 1.000000e-10 : f32
    %23 = vector.shape_cast %15 : vector<1x8xi1> to vector<1x8xi1>
    %24 = vector.broadcast %23 : vector<1x8xi1> to vector<8x8xi1>
    %25 = vector.broadcast %cst_13 : f32 to vector<8x8xf32>
    %26 = arith.select %24, %25, %22 : vector<8x8xi1>, vector<8x8xf32>
    %cst_14 = arith.constant dense<0xFF800000> : vector<8xf32>
    %27 = vector.multi_reduction <maximumf>, %26, %cst_14 [1] : vector<8x8xf32> to vector<8xf32>
    %28 = vector.shape_cast %27 : vector<8xf32> to vector<8x1xf32>
    %29 = vector.broadcast %28 : vector<8x1xf32> to vector<8x8xf32>
    %30 = arith.subf %26, %29 : vector<8x8xf32>
    %31 = math.exp %30 : vector<8x8xf32>
    %cst_15 = arith.constant dense<0.000000e+00> : vector<8xf32>
    %32 = vector.multi_reduction <add>, %31, %cst_15 [1] : vector<8x8xf32> to vector<8xf32>
    %33 = vector.shape_cast %32 : vector<8xf32> to vector<8x1xf32>
    %34 = tpu.reciprocal %33 {approx = true} : vector<8x1xf32> -> vector<8x1xf32>
    %35 = vector.broadcast %34 : vector<8x1xf32> to vector<8x8xf32>
    %36 = arith.mulf %31, %35 : vector<8x8xf32>
    %c0_16 = arith.constant 0 : index
    %c0_17 = arith.constant 0 : index
    %c0_18 = arith.constant 0 : index
    %c0_19 = arith.constant 0 : index
    %c0_20 = arith.constant 0 : index
    %37 = vector.load %arg18[%c0_16, %c0_17, %c0_18, %c0_19, %c0_20] : memref<1x1x4x8x8xf32, #tpu.memory_space<vmem>>, vector<1x1x1x8x8xf32>
    %38 = vector.shape_cast %37 : vector<1x1x1x8x8xf32> to vector<8x8xf32>
    %39 = vector.shape_cast %36 : vector<8x8xf32> to vector<1x1x1x8x8xf32>
    tpu.vector_store %arg18[%c0_16, %c0_17, %c0_18, %c0_19, %c0_20], %39 {strides = array<i32>} : memref<1x1x4x8x8xf32, #tpu.memory_space<vmem>>, vector<1x1x1x8x8xf32>,
    %40 = arith.truncf %36 : vector<8x8xf32> to vector<8x8xbf16>
    %cst_21 = arith.constant dense<0.000000e+00> : vector<8x8xf32>
    %41 = tpu.matmul %40, %21, %cst_21 {dimension_numbers = #tpu.dot_dimension_numbers<[1], [0], [0], [1], [0, 0, 1, 1], [], []>} : vector<8x8xbf16>, vector<8x8xbf16>, vector<8x8xf32> -> vector<8x8xf32>
    %42 = arith.truncf %41 : vector<8x8xf32> to vector<8x8xbf16>
    %c0_22 = arith.constant 0 : index
    %c0_23 = arith.constant 0 : index
    %43 = vector.load %arg20[%c0_22, %c0_23] : memref<8x32xbf16, #tpu.memory_space<vmem>>, vector<8x8xbf16>
    tpu.vector_store %arg20[%c0_22, %c0_23], %42 {strides = array<i32>} : memref<8x32xbf16, #tpu.memory_space<vmem>>, vector<8x8xbf16>,
    %44 = vector.extract_strided_slice %11 {offsets = [0, 8], sizes = [8, 8], strides = [1, 1]} : vector<8x96xf32> to vector<8x8xf32>
    %45 = arith.truncf %44 : vector<8x8xf32> to vector<8x8xbf16>
    %46 = vector.extract_strided_slice %11 {offsets = [0, 40], sizes = [8, 8], strides = [1, 1]} : vector<8x96xf32> to vector<8x8xf32>
    %47 = arith.truncf %46 : vector<8x8xf32> to vector<8x8xbf16>
    %48 = vector.extract_strided_slice %11 {offsets = [0, 72], sizes = [8, 8], strides = [1, 1]} : vector<8x96xf32> to vector<8x8xf32>
    %49 = arith.truncf %48 : vector<8x8xf32> to vector<8x8xbf16>
    %cst_24 = arith.constant dense<0.000000e+00> : vector<8x8xf32>
    %50 = tpu.matmul %45, %47, %cst_24 {dimension_numbers = #tpu.dot_dimension_numbers<[1], [1], [0], [0], [0, 0, 1, 0], [], []>} : vector<8x8xbf16>, vector<8x8xbf16>, vector<8x8xf32> -> vector<8x8xf32>
    %cst_25 = arith.constant 1.000000e-10 : f32
    %51 = vector.shape_cast %15 : vector<1x8xi1> to vector<1x8xi1>
    %52 = vector.broadcast %51 : vector<1x8xi1> to vector<8x8xi1>
    %53 = vector.broadcast %cst_25 : f32 to vector<8x8xf32>
    %54 = arith.select %52, %53, %50 : vector<8x8xi1>, vector<8x8xf32>
    %cst_26 = arith.constant dense<0xFF800000> : vector<8xf32>
    %55 = vector.multi_reduction <maximumf>, %54, %cst_26 [1] : vector<8x8xf32> to vector<8xf32>
    %56 = vector.shape_cast %55 : vector<8xf32> to vector<8x1xf32>
    %57 = vector.broadcast %56 : vector<8x1xf32> to vector<8x8xf32>
    %58 = arith.subf %54, %57 : vector<8x8xf32>
    %59 = math.exp %58 : vector<8x8xf32>
    %cst_27 = arith.constant dense<0.000000e+00> : vector<8xf32>
    %60 = vector.multi_reduction <add>, %59, %cst_27 [1] : vector<8x8xf32> to vector<8xf32>
    %61 = vector.shape_cast %60 : vector<8xf32> to vector<8x1xf32>
    %62 = tpu.reciprocal %61 {approx = true} : vector<8x1xf32> -> vector<8x1xf32>
    %63 = vector.broadcast %62 : vector<8x1xf32> to vector<8x8xf32>
    %64 = arith.mulf %59, %63 : vector<8x8xf32>
    %c0_28 = arith.constant 0 : index
    %c0_29 = arith.constant 0 : index
    %c1 = arith.constant 1 : index
    %c0_30 = arith.constant 0 : index
    %c0_31 = arith.constant 0 : index
    %65 = vector.load %arg18[%c0_28, %c0_29, %c1, %c0_30, %c0_31] : memref<1x1x4x8x8xf32, #tpu.memory_space<vmem>>, vector<1x1x1x8x8xf32>
    %66 = vector.shape_cast %65 : vector<1x1x1x8x8xf32> to vector<8x8xf32>
    %67 = vector.shape_cast %64 : vector<8x8xf32> to vector<1x1x1x8x8xf32>
    tpu.vector_store %arg18[%c0_28, %c0_29, %c1, %c0_30, %c0_31], %67 {strides = array<i32>} : memref<1x1x4x8x8xf32, #tpu.memory_space<vmem>>, vector<1x1x1x8x8xf32>,
    %68 = arith.truncf %64 : vector<8x8xf32> to vector<8x8xbf16>
    %cst_32 = arith.constant dense<0.000000e+00> : vector<8x8xf32>
    %69 = tpu.matmul %68, %49, %cst_32 {dimension_numbers = #tpu.dot_dimension_numbers<[1], [0], [0], [1], [0, 0, 1, 1], [], []>} : vector<8x8xbf16>, vector<8x8xbf16>, vector<8x8xf32> -> vector<8x8xf32>
    %70 = arith.truncf %69 : vector<8x8xf32> to vector<8x8xbf16>
    %c0_33 = arith.constant 0 : index
    %c8 = arith.constant 8 : index
    %71 = vector.load %arg20[%c0_33, %c8] : memref<8x32xbf16, #tpu.memory_space<vmem>>, vector<8x8xbf16>
    tpu.vector_store %arg20[%c0_33, %c8], %70 {strides = array<i32>} : memref<8x32xbf16, #tpu.memory_space<vmem>>, vector<8x8xbf16>,
    %72 = vector.extract_strided_slice %11 {offsets = [0, 16], sizes = [8, 8], strides = [1, 1]} : vector<8x96xf32> to vector<8x8xf32>
    %73 = arith.truncf %72 : vector<8x8xf32> to vector<8x8xbf16>
    %74 = vector.extract_strided_slice %11 {offsets = [0, 48], sizes = [8, 8], strides = [1, 1]} : vector<8x96xf32> to vector<8x8xf32>
    %75 = arith.truncf %74 : vector<8x8xf32> to vector<8x8xbf16>
    %76 = vector.extract_strided_slice %11 {offsets = [0, 80], sizes = [8, 8], strides = [1, 1]} : vector<8x96xf32> to vector<8x8xf32>
    %77 = arith.truncf %76 : vector<8x8xf32> to vector<8x8xbf16>
    %cst_34 = arith.constant dense<0.000000e+00> : vector<8x8xf32>
    %78 = tpu.matmul %73, %75, %cst_34 {dimension_numbers = #tpu.dot_dimension_numbers<[1], [1], [0], [0], [0, 0, 1, 0], [], []>} : vector<8x8xbf16>, vector<8x8xbf16>, vector<8x8xf32> -> vector<8x8xf32>
    %cst_35 = arith.constant 1.000000e-10 : f32
    %79 = vector.shape_cast %15 : vector<1x8xi1> to vector<1x8xi1>
    %80 = vector.broadcast %79 : vector<1x8xi1> to vector<8x8xi1>
    %81 = vector.broadcast %cst_35 : f32 to vector<8x8xf32>
    %82 = arith.select %80, %81, %78 : vector<8x8xi1>, vector<8x8xf32>
    %cst_36 = arith.constant dense<0xFF800000> : vector<8xf32>
    %83 = vector.multi_reduction <maximumf>, %82, %cst_36 [1] : vector<8x8xf32> to vector<8xf32>
    %84 = vector.shape_cast %83 : vector<8xf32> to vector<8x1xf32>
    %85 = vector.broadcast %84 : vector<8x1xf32> to vector<8x8xf32>
    %86 = arith.subf %82, %85 : vector<8x8xf32>
    %87 = math.exp %86 : vector<8x8xf32>
    %cst_37 = arith.constant dense<0.000000e+00> : vector<8xf32>
    %88 = vector.multi_reduction <add>, %87, %cst_37 [1] : vector<8x8xf32> to vector<8xf32>
    %89 = vector.shape_cast %88 : vector<8xf32> to vector<8x1xf32>
    %90 = tpu.reciprocal %89 {approx = true} : vector<8x1xf32> -> vector<8x1xf32>
    %91 = vector.broadcast %90 : vector<8x1xf32> to vector<8x8xf32>
    %92 = arith.mulf %87, %91 : vector<8x8xf32>
    %c0_38 = arith.constant 0 : index
    %c0_39 = arith.constant 0 : index
    %c2 = arith.constant 2 : index
    %c0_40 = arith.constant 0 : index
    %c0_41 = arith.constant 0 : index
    %93 = vector.load %arg18[%c0_38, %c0_39, %c2, %c0_40, %c0_41] : memref<1x1x4x8x8xf32, #tpu.memory_space<vmem>>, vector<1x1x1x8x8xf32>
    %94 = vector.shape_cast %93 : vector<1x1x1x8x8xf32> to vector<8x8xf32>
    %95 = vector.shape_cast %92 : vector<8x8xf32> to vector<1x1x1x8x8xf32>
    tpu.vector_store %arg18[%c0_38, %c0_39, %c2, %c0_40, %c0_41], %95 {strides = array<i32>} : memref<1x1x4x8x8xf32, #tpu.memory_space<vmem>>, vector<1x1x1x8x8xf32>,
    %96 = arith.truncf %92 : vector<8x8xf32> to vector<8x8xbf16>
    %cst_42 = arith.constant dense<0.000000e+00> : vector<8x8xf32>
    %97 = tpu.matmul %96, %77, %cst_42 {dimension_numbers = #tpu.dot_dimension_numbers<[1], [0], [0], [1], [0, 0, 1, 1], [], []>} : vector<8x8xbf16>, vector<8x8xbf16>, vector<8x8xf32> -> vector<8x8xf32>
    %98 = arith.truncf %97 : vector<8x8xf32> to vector<8x8xbf16>
    %c0_43 = arith.constant 0 : index
    %c16 = arith.constant 16 : index
    %99 = vector.load %arg20[%c0_43, %c16] : memref<8x32xbf16, #tpu.memory_space<vmem>>, vector<8x8xbf16>
    tpu.vector_store %arg20[%c0_43, %c16], %98 {strides = array<i32>} : memref<8x32xbf16, #tpu.memory_space<vmem>>, vector<8x8xbf16>,
    %100 = vector.extract_strided_slice %11 {offsets = [0, 24], sizes = [8, 8], strides = [1, 1]} : vector<8x96xf32> to vector<8x8xf32>
    %101 = arith.truncf %100 : vector<8x8xf32> to vector<8x8xbf16>
    %102 = vector.extract_strided_slice %11 {offsets = [0, 56], sizes = [8, 8], strides = [1, 1]} : vector<8x96xf32> to vector<8x8xf32>
    %103 = arith.truncf %102 : vector<8x8xf32> to vector<8x8xbf16>
    %104 = vector.extract_strided_slice %11 {offsets = [0, 88], sizes = [8, 8], strides = [1, 1]} : vector<8x96xf32> to vector<8x8xf32>
    %105 = arith.truncf %104 : vector<8x8xf32> to vector<8x8xbf16>
    %cst_44 = arith.constant dense<0.000000e+00> : vector<8x8xf32>
    %106 = tpu.matmul %101, %103, %cst_44 {dimension_numbers = #tpu.dot_dimension_numbers<[1], [1], [0], [0], [0, 0, 1, 0], [], []>} : vector<8x8xbf16>, vector<8x8xbf16>, vector<8x8xf32> -> vector<8x8xf32>
    %cst_45 = arith.constant 1.000000e-10 : f32
    %107 = vector.shape_cast %15 : vector<1x8xi1> to vector<1x8xi1>
    %108 = vector.broadcast %107 : vector<1x8xi1> to vector<8x8xi1>
    %109 = vector.broadcast %cst_45 : f32 to vector<8x8xf32>
    %110 = arith.select %108, %109, %106 : vector<8x8xi1>, vector<8x8xf32>
    %cst_46 = arith.constant dense<0xFF800000> : vector<8xf32>
    %111 = vector.multi_reduction <maximumf>, %110, %cst_46 [1] : vector<8x8xf32> to vector<8xf32>
    %112 = vector.shape_cast %111 : vector<8xf32> to vector<8x1xf32>
    %113 = vector.broadcast %112 : vector<8x1xf32> to vector<8x8xf32>
    %114 = arith.subf %110, %113 : vector<8x8xf32>
    %115 = math.exp %114 : vector<8x8xf32>
    %cst_47 = arith.constant dense<0.000000e+00> : vector<8xf32>
    %116 = vector.multi_reduction <add>, %115, %cst_47 [1] : vector<8x8xf32> to vector<8xf32>
    %117 = vector.shape_cast %116 : vector<8xf32> to vector<8x1xf32>
    %118 = tpu.reciprocal %117 {approx = true} : vector<8x1xf32> -> vector<8x1xf32>
    %119 = vector.broadcast %118 : vector<8x1xf32> to vector<8x8xf32>
    %120 = arith.mulf %115, %119 : vector<8x8xf32>
    %c0_48 = arith.constant 0 : index
    %c0_49 = arith.constant 0 : index
    %c3 = arith.constant 3 : index
    %c0_50 = arith.constant 0 : index
    %c0_51 = arith.constant 0 : index
    %121 = vector.load %arg18[%c0_48, %c0_49, %c3, %c0_50, %c0_51] : memref<1x1x4x8x8xf32, #tpu.memory_space<vmem>>, vector<1x1x1x8x8xf32>
    %122 = vector.shape_cast %121 : vector<1x1x1x8x8xf32> to vector<8x8xf32>
    %123 = vector.shape_cast %120 : vector<8x8xf32> to vector<1x1x1x8x8xf32>
    tpu.vector_store %arg18[%c0_48, %c0_49, %c3, %c0_50, %c0_51], %123 {strides = array<i32>} : memref<1x1x4x8x8xf32, #tpu.memory_space<vmem>>, vector<1x1x1x8x8xf32>,
    %124 = arith.truncf %120 : vector<8x8xf32> to vector<8x8xbf16>
    %cst_52 = arith.constant dense<0.000000e+00> : vector<8x8xf32>
    %125 = tpu.matmul %124, %105, %cst_52 {dimension_numbers = #tpu.dot_dimension_numbers<[1], [0], [0], [1], [0, 0, 1, 1], [], []>} : vector<8x8xbf16>, vector<8x8xbf16>, vector<8x8xf32> -> vector<8x8xf32>
    %126 = arith.truncf %125 : vector<8x8xf32> to vector<8x8xbf16>
    %c0_53 = arith.constant 0 : index
    %c24 = arith.constant 24 : index
    %127 = vector.load %arg20[%c0_53, %c24] : memref<8x32xbf16, #tpu.memory_space<vmem>>, vector<8x8xbf16>
    tpu.vector_store %arg20[%c0_53, %c24], %126 {strides = array<i32>} : memref<8x32xbf16, #tpu.memory_space<vmem>>, vector<8x8xbf16>,
    %c0_54 = arith.constant 0 : index
    %c0_55 = arith.constant 0 : index
    %128 = vector.load %arg20[%c0_54, %c0_55] : memref<8x32xbf16, #tpu.memory_space<vmem>>, vector<8x32xbf16>
    %c0_56 = arith.constant 0 : index
    %c0_57 = arith.constant 0 : index
    %c0_58 = arith.constant 0 : index
    %129 = vector.load %arg7[%c0_56, %c0_57, %c0_58] : memref<1x32x32xbf16, #tpu.memory_space<vmem>>, vector<1x32x32xbf16>
    %130 = vector.shape_cast %129 : vector<1x32x32xbf16> to vector<32x32xbf16>
    %cst_59 = arith.constant dense<0.000000e+00> : vector<8x32xf32>
    %131 = tpu.matmul %128, %130, %cst_59 {dimension_numbers = #tpu.dot_dimension_numbers<[1], [0], [0], [1], [0, 0, 1, 1], [], []>} : vector<8x32xbf16>, vector<32x32xbf16>, vector<8x32xf32> -> vector<8x32xf32>
    %c0_60 = arith.constant 0 : index
    %c0_61 = arith.constant 0 : index
    %c0_62 = arith.constant 0 : index
    %132 = vector.load %arg8[%c0_60, %c0_61, %c0_62] : memref<1x1x32xf32, #tpu.memory_space<vmem>>, vector<1x1x32xf32>
    %133 = vector.shape_cast %132 : vector<1x1x32xf32> to vector<1x32xf32>
    %134 = vector.broadcast %133 : vector<1x32xf32> to vector<8x32xf32>
    %135 = arith.addf %131, %134 : vector<8x32xf32>
    %136 = arith.addf %3, %135 : vector<8x32xf32>
    %cst_63 = arith.constant dense<0.000000e+00> : vector<8xf32>
    %137 = vector.multi_reduction <add>, %136, %cst_63 [1] : vector<8x32xf32> to vector<8xf32>
    %138 = vector.shape_cast %137 : vector<8xf32> to vector<8x1xf32>
    %cst_64 = arith.constant 3.200000e+01 : f32
    %139 = vector.broadcast %cst_64 : f32 to vector<8x1xf32>
    %140 = arith.divf %138, %139 : vector<8x1xf32>
    %141 = vector.broadcast %140 : vector<8x1xf32> to vector<8x32xf32>
    %142 = arith.subf %136, %141 : vector<8x32xf32>
    %143 = arith.mulf %142, %142 : vector<8x32xf32>
    %cst_65 = arith.constant dense<0.000000e+00> : vector<8xf32>
    %144 = vector.multi_reduction <add>, %143, %cst_65 [1] : vector<8x32xf32> to vector<8xf32>
    %145 = vector.shape_cast %144 : vector<8xf32> to vector<8x1xf32>
    %cst_66 = arith.constant 3.200000e+01 : f32
    %146 = vector.broadcast %cst_66 : f32 to vector<8x1xf32>
    %147 = arith.divf %145, %146 : vector<8x1xf32>
    %148 = vector.broadcast %140 : vector<8x1xf32> to vector<8x32xf32>
    %149 = arith.subf %136, %148 : vector<8x32xf32>
    %cst_67 = arith.constant 9.99999974E-6 : f32
    %150 = vector.broadcast %cst_67 : f32 to vector<8x1xf32>
    %151 = arith.addf %147, %150 : vector<8x1xf32>
    %152 = math.rsqrt %151 : vector<8x1xf32>
    %153 = vector.broadcast %152 : vector<8x1xf32> to vector<8x32xf32>
    %154 = arith.mulf %149, %153 : vector<8x32xf32>
    %c0_68 = arith.constant 0 : index
    %c0_69 = arith.constant 0 : index
    %c0_70 = arith.constant 0 : index
    %155 = vector.load %arg9[%c0_68, %c0_69, %c0_70] : memref<1x1x32xf32, #tpu.memory_space<vmem>>, vector<1x1x32xf32>
    %156 = vector.shape_cast %155 : vector<1x1x32xf32> to vector<1x32xf32>
    %157 = vector.broadcast %156 : vector<1x32xf32> to vector<8x32xf32>
    %158 = arith.mulf %154, %157 : vector<8x32xf32>
    %c0_71 = arith.constant 0 : index
    %c0_72 = arith.constant 0 : index
    %c0_73 = arith.constant 0 : index
    %159 = vector.load %arg10[%c0_71, %c0_72, %c0_73] : memref<1x1x32xf32, #tpu.memory_space<vmem>>, vector<1x1x32xf32>
    %160 = vector.shape_cast %159 : vector<1x1x32xf32> to vector<1x32xf32>
    %161 = vector.broadcast %160 : vector<1x32xf32> to vector<8x32xf32>
    %162 = arith.addf %158, %161 : vector<8x32xf32>
    %163 = arith.truncf %162 : vector<8x32xf32> to vector<8x32xbf16>
    %c0_74 = arith.constant 0 : index
    %c0_75 = arith.constant 0 : index
    %c0_76 = arith.constant 0 : index
    %164 = vector.load %arg11[%c0_74, %c0_75, %c0_76] : memref<1x32x64xbf16, #tpu.memory_space<vmem>>, vector<1x32x64xbf16>
    %165 = vector.shape_cast %164 : vector<1x32x64xbf16> to vector<32x64xbf16>
    %cst_77 = arith.constant dense<0.000000e+00> : vector<8x64xf32>
    %166 = tpu.matmul %163, %165, %cst_77 {dimension_numbers = #tpu.dot_dimension_numbers<[1], [0], [0], [1], [0, 0, 1, 1], [], []>} : vector<8x32xbf16>, vector<32x64xbf16>, vector<8x64xf32> -> vector<8x64xf32>
    %c0_78 = arith.constant 0 : index
    %c0_79 = arith.constant 0 : index
    %c0_80 = arith.constant 0 : index
    %167 = vector.load %arg12[%c0_78, %c0_79, %c0_80] : memref<1x1x64xf32, #tpu.memory_space<vmem>>, vector<1x1x64xf32>
    %168 = vector.shape_cast %167 : vector<1x1x64xf32> to vector<1x64xf32>
    %169 = vector.broadcast %168 : vector<1x64xf32> to vector<8x64xf32>
    %170 = arith.addf %166, %169 : vector<8x64xf32>
    %cst_81 = arith.constant 0.000000e+00 : f32
    %171 = vector.broadcast %cst_81 : f32 to vector<8x64xf32>
    %172 = arith.maximumf %170, %171 : vector<8x64xf32>
    %173 = arith.truncf %172 : vector<8x64xf32> to vector<8x64xbf16>
    %c0_82 = arith.constant 0 : index
    %c0_83 = arith.constant 0 : index
    %c0_84 = arith.constant 0 : index
    %174 = vector.load %arg13[%c0_82, %c0_83, %c0_84] : memref<1x64x32xbf16, #tpu.memory_space<vmem>>, vector<1x64x32xbf16>
    %175 = vector.shape_cast %174 : vector<1x64x32xbf16> to vector<64x32xbf16>
    %cst_85 = arith.constant dense<0.000000e+00> : vector<8x32xf32>
    %176 = tpu.matmul %173, %175, %cst_85 {dimension_numbers = #tpu.dot_dimension_numbers<[1], [0], [0], [1], [0, 0, 1, 1], [], []>} : vector<8x64xbf16>, vector<64x32xbf16>, vector<8x32xf32> -> vector<8x32xf32>
    %c0_86 = arith.constant 0 : index
    %c0_87 = arith.constant 0 : index
    %c0_88 = arith.constant 0 : index
    %177 = vector.load %arg14[%c0_86, %c0_87, %c0_88] : memref<1x1x32xf32, #tpu.memory_space<vmem>>, vector<1x1x32xf32>
    %178 = vector.shape_cast %177 : vector<1x1x32xf32> to vector<1x32xf32>
    %179 = vector.broadcast %178 : vector<1x32xf32> to vector<8x32xf32>
    %180 = arith.addf %176, %179 : vector<8x32xf32>
    %181 = arith.addf %162, %180 : vector<8x32xf32>
    %cst_89 = arith.constant dense<0.000000e+00> : vector<8xf32>
    %182 = vector.multi_reduction <add>, %181, %cst_89 [1] : vector<8x32xf32> to vector<8xf32>
    %183 = vector.shape_cast %182 : vector<8xf32> to vector<8x1xf32>
    %cst_90 = arith.constant 3.200000e+01 : f32
    %184 = vector.broadcast %cst_90 : f32 to vector<8x1xf32>
    %185 = arith.divf %183, %184 : vector<8x1xf32>
    %186 = vector.broadcast %185 : vector<8x1xf32> to vector<8x32xf32>
    %187 = arith.subf %181, %186 : vector<8x32xf32>
    %188 = arith.mulf %187, %187 : vector<8x32xf32>
    %cst_91 = arith.constant dense<0.000000e+00> : vector<8xf32>
    %189 = vector.multi_reduction <add>, %188, %cst_91 [1] : vector<8x32xf32> to vector<8xf32>
    %190 = vector.shape_cast %189 : vector<8xf32> to vector<8x1xf32>
    %cst_92 = arith.constant 3.200000e+01 : f32
    %191 = vector.broadcast %cst_92 : f32 to vector<8x1xf32>
    %192 = arith.divf %190, %191 : vector<8x1xf32>
    %193 = vector.broadcast %185 : vector<8x1xf32> to vector<8x32xf32>
    %194 = arith.subf %181, %193 : vector<8x32xf32>
    %cst_93 = arith.constant 9.99999974E-6 : f32
    %195 = vector.broadcast %cst_93 : f32 to vector<8x1xf32>
    %196 = arith.addf %192, %195 : vector<8x1xf32>
    %197 = math.rsqrt %196 : vector<8x1xf32>
    %198 = vector.broadcast %197 : vector<8x1xf32> to vector<8x32xf32>
    %199 = arith.mulf %194, %198 : vector<8x32xf32>
    %c0_94 = arith.constant 0 : index
    %c0_95 = arith.constant 0 : index
    %c0_96 = arith.constant 0 : index
    %200 = vector.load %arg15[%c0_94, %c0_95, %c0_96] : memref<1x1x32xf32, #tpu.memory_space<vmem>>, vector<1x1x32xf32>
    %201 = vector.shape_cast %200 : vector<1x1x32xf32> to vector<1x32xf32>
    %202 = vector.broadcast %201 : vector<1x32xf32> to vector<8x32xf32>
    %203 = arith.mulf %199, %202 : vector<8x32xf32>
    %c0_97 = arith.constant 0 : index
    %c0_98 = arith.constant 0 : index
    %c0_99 = arith.constant 0 : index
    %204 = vector.load %arg16[%c0_97, %c0_98, %c0_99] : memref<1x1x32xf32, #tpu.memory_space<vmem>>, vector<1x1x32xf32>
    %205 = vector.shape_cast %204 : vector<1x1x32xf32> to vector<1x32xf32>
    %206 = vector.broadcast %205 : vector<1x32xf32> to vector<8x32xf32>
    %207 = arith.addf %203, %206 : vector<8x32xf32>
    %c0_100 = arith.constant 0 : index
    %c0_101 = arith.constant 0 : index
    %208 = vector.load %arg19[%c0_100, %c0_101] : memref<8x32xf32, #tpu.memory_space<vmem>>, vector<8x32xf32>
    tpu.vector_store %arg19[%c0_100, %c0_101], %207 {strides = array<i32>} : memref<8x32xf32, #tpu.memory_space<vmem>>, vector<8x32xf32>,
    %c1_i32 = arith.constant 1 : i32
    %209 = arith.cmpi eq, %arg1, %c1_i32 : i32
    %210 = arith.extui %209 : i1 to i32
    %c0_i32_102 = arith.constant 0 : i32
    %211 = arith.cmpi ne, %210, %c0_i32_102 : i32
    scf.if %211 {
      %c0_103 = arith.constant 0 : index
      %c0_104 = arith.constant 0 : index
      %c0_105 = arith.constant 0 : index
      %212 = vector.load %arg17[%c0_103, %c0_104, %c0_105] : memref<1x8x32xf32, #tpu.memory_space<vmem>>, vector<1x8x32xf32>
      %213 = vector.shape_cast %212 : vector<1x8x32xf32> to vector<8x32xf32>
      %214 = vector.shape_cast %207 : vector<8x32xf32> to vector<1x8x32xf32>
      tpu.vector_store %arg17[%c0_103, %c0_104, %c0_105], %214 {strides = array<i32>} : memref<1x8x32xf32, #tpu.memory_space<vmem>>, vector<1x8x32xf32>,
    } else {
    }
    return
  }
  func.func @transform_0(%arg0: i32, %arg1: i32) -> (i32, i32, i32) {
    %c0_i32 = arith.constant 0 : i32
    %c0_i32_0 = arith.constant 0 : i32
    %c0_i32_1 = arith.constant 0 : i32
    return %arg0, %c0_i32, %c0_i32_0 : i32, i32, i32
  }
  func.func @transform_1(%arg0: i32, %arg1: i32) -> (i32, i32) {
    %c0_i32 = arith.constant 0 : i32
    %c0_i32_0 = arith.constant 0 : i32
    %c0_i32_1 = arith.constant 0 : i32
    return %c0_i32, %c0_i32_0 : i32, i32
  }
  func.func @transform_2(%arg0: i32, %arg1: i32) -> (i32, i32, i32) {
    %c0_i32 = arith.constant 0 : i32
    %c0_i32_0 = arith.constant 0 : i32
    %c0_i32_1 = arith.constant 0 : i32
    return %arg0, %c0_i32, %c0_i32_0 : i32, i32, i32
  }
  func.func @transform_3(%arg0: i32, %arg1: i32) -> (i32, i32, i32) {
    %c0_i32 = arith.constant 0 : i32
    %c0_i32_0 = arith.constant 0 : i32
    %c0_i32_1 = arith.constant 0 : i32
    return %arg1, %c0_i32, %c0_i32_0 : i32, i32, i32
  }
  func.func @transform_4(%arg0: i32, %arg1: i32) -> (i32, i32, i32) {
    %c0_i32 = arith.constant 0 : i32
    %c0_i32_0 = arith.constant 0 : i32
    %c0_i32_1 = arith.constant 0 : i32
    return %arg1, %c0_i32, %c0_i32_0 : i32, i32, i32
  }
  func.func @transform_5(%arg0: i32, %arg1: i32) -> (i32, i32, i32) {
    %c0_i32 = arith.constant 0 : i32
    %c0_i32_0 = arith.constant 0 : i32
    %c0_i32_1 = arith.constant 0 : i32
    return %arg1, %c0_i32, %c0_i32_0 : i32, i32, i32
  }
  func.func @transform_6(%arg0: i32, %arg1: i32) -> (i32, i32, i32) {
    %c0_i32 = arith.constant 0 : i32
    %c0_i32_0 = arith.constant 0 : i32
    %c0_i32_1 = arith.constant 0 : i32
    return %arg1, %c0_i32, %c0_i32_0 : i32, i32, i32
  }
  func.func @transform_7(%arg0: i32, %arg1: i32) -> (i32, i32, i32) {
    %c0_i32 = arith.constant 0 : i32
    %c0_i32_0 = arith.constant 0 : i32
    %c0_i32_1 = arith.constant 0 : i32
    return %arg1, %c0_i32, %c0_i32_0 : i32, i32, i32
  }
  func.func @transform_8(%arg0: i32, %arg1: i32) -> (i32, i32, i32) {
    %c0_i32 = arith.constant 0 : i32
    %c0_i32_0 = arith.constant 0 : i32
    %c0_i32_1 = arith.constant 0 : i32
    return %arg1, %c0_i32, %c0_i32_0 : i32, i32, i32
  }
  func.func @transform_9(%arg0: i32, %arg1: i32) -> (i32, i32, i32) {
    %c0_i32 = arith.constant 0 : i32
    %c0_i32_0 = arith.constant 0 : i32
    %c0_i32_1 = arith.constant 0 : i32
    return %arg1, %c0_i32, %c0_i32_0 : i32, i32, i32
  }
  func.func @transform_10(%arg0: i32, %arg1: i32) -> (i32, i32, i32) {
    %c0_i32 = arith.constant 0 : i32
    %c0_i32_0 = arith.constant 0 : i32
    %c0_i32_1 = arith.constant 0 : i32
    return %arg1, %c0_i32, %c0_i32_0 : i32, i32, i32
  }
  func.func @transform_11(%arg0: i32, %arg1: i32) -> (i32, i32, i32) {
    %c0_i32 = arith.constant 0 : i32
    %c0_i32_0 = arith.constant 0 : i32
    %c0_i32_1 = arith.constant 0 : i32
    return %arg1, %c0_i32, %c0_i32_0 : i32, i32, i32
  }
  func.func @transform_12(%arg0: i32, %arg1: i32) -> (i32, i32, i32) {
    %c0_i32 = arith.constant 0 : i32
    %c0_i32_0 = arith.constant 0 : i32
    %c0_i32_1 = arith.constant 0 : i32
    return %arg1, %c0_i32, %c0_i32_0 : i32, i32, i32
  }
  func.func @transform_13(%arg0: i32, %arg1: i32) -> (i32, i32, i32) {
    %c0_i32 = arith.constant 0 : i32
    %c0_i32_0 = arith.constant 0 : i32
    %c0_i32_1 = arith.constant 0 : i32
    return %arg1, %c0_i32, %c0_i32_0 : i32, i32, i32
  }
  func.func @transform_14(%arg0: i32, %arg1: i32) -> (i32, i32, i32) {
    %c0_i32 = arith.constant 0 : i32
    %c0_i32_0 = arith.constant 0 : i32
    %c0_i32_1 = arith.constant 0 : i32
    return %arg1, %c0_i32, %c0_i32_0 : i32, i32, i32
  }
  func.func @transform_15(%arg0: i32, %arg1: i32) -> (i32, i32, i32) {
    %c0_i32 = arith.constant 0 : i32
    %c0_i32_0 = arith.constant 0 : i32
    %c0_i32_1 = arith.constant 0 : i32
    return %arg0, %c0_i32, %c0_i32_0 : i32, i32, i32
  }
  func.func @transform_16(%arg0: i32, %arg1: i32) -> (i32, i32, i32, i32, i32) {
    %c0_i32 = arith.constant 0 : i32
    %c0_i32_0 = arith.constant 0 : i32
    %c0_i32_1 = arith.constant 0 : i32
    %c0_i32_2 = arith.constant 0 : i32
    return %arg0, %arg1, %c0_i32, %c0_i32_0, %c0_i32_1 : i32, i32, i32, i32, i32
  }
}

</mosaic_0001>

<bundles_post_ra>
// kernel: encoder_forward.1
= control target key start
LH: loop header
LB: loop body
LE: loop exit
PB: predicated region body
PF: predicated region fallthrough
CT: control target
= control target key end

     0   :  { %s2284_s0 = inlined_call_operand.vmem [shape: f32[2,8,32], index: 0, kind: input, shape index: {}]   ;;  %s2285_s1 = inlined_call_operand.vmem [shape: f32[8,32], index: 1, kind: input, shape index: {}]   ;;  %s2286_s2 = inlined_call_operand.vmem [shape: s32[2,1,8], index: 2, kind: input, shape index: {}]   ;;  %s2287_s3 = inlined_call_operand.vmem [shape: bf16[2,32,96], index: 3, kind: input, shape index: {}]   ;;  %s2288_s4 = inlined_call_operand.vmem [shape: f32[2,1,96], index: 4, kind: input, shape index: {}]   ;;  %s2289_s5 = inlined_call_operand.vmem [shape: bf16[2,32,32], index: 5, kind: input, shape index: {}]   ;;  %s2290_s6 = inlined_call_operand.vmem [shape: f32[2,1,32], index: 6, kind: input, shape index: {}]   ;;  %s2291_s7 = inlined_call_operand.vmem [shape: f32[2,1,32], index: 7, kind: input, shape index: {}]   ;;  %s2292_s8 = inlined_call_operand.vmem [shape: f32[2,1,32], index: 8, kind: input, shape index: {}]   ;;  %s2293_s9 = inlined_call_operand.vmem [shape: bf16[2,32,64], index: 9, kind: input, shape index: {}]   ;;  %s2294_s10 = inlined_call_operand.vmem [shape: f32[2,1,64], index: 10, kind: input, shape index: {}]   ;;  %s2295_s11 = inlined_call_operand.vmem [shape: bf16[2,64,32], index: 11, kind: input, shape index: {}]   ;;  %s2296_s12 = inlined_call_operand.vmem [shape: f32[2,1,32], index: 12, kind: input, shape index: {}]   ;;  %s2297_s13 = inlined_call_operand.vmem [shape: f32[2,1,32], index: 13, kind: input, shape index: {}]   ;;  %s2298_s14 = inlined_call_operand.vmem [shape: f32[2,1,32], index: 14, kind: input, shape index: {}]   ;;  %s2299_s15 = inlined_call_operand.hbm [shape: f32[2,8,32], index: 15, kind: output, shape index: {0}]   ;;  %s2300_s16 = inlined_call_operand.vmem [shape: f32[2,2,4,8,8], index: 16, kind: output, shape index: {1}]  }
   0x1   :  { %2317 = sst [smem:[#allocation21_spill]] %s2284_s0 }
   0x2   :  { %2318 = sst [smem:[#allocation22_spill]] %s2285_s1 }
   0x3   :  { %2319 = sst [smem:[#allocation23_spill]] %s2286_s2 }
   0x4   :  { %2320 = sst [smem:[#allocation24_spill]] %s2287_s3 }
   0x5   :  { %2321 = sst [smem:[#allocation25_spill]] %s2289_s5 }
   0x6   :  { %2322 = sst [smem:[#allocation26_spill]] %s2291_s7 }
   0x7   :  { %2323 = sst [smem:[#allocation27_spill]] %s2292_s8 }
   0x8   :  { %2324 = sst [smem:[#allocation28_spill]] %s2293_s9 }
   0x9   :  { %2325 = sst [smem:[#allocation29_spill]] %s2294_s10 }
   0xa   :  { %2326 = sst [smem:[#allocation30_spill]] %s2297_s13 }
   0xb   :  { %2327 = sst [smem:[#allocation31_spill]] %s2298_s14 }
   0xc   :  { %2328 = sst [smem:[#allocation32_spill]] %s2299_s15 }
   0xd   :  { %2329 = sst [smem:[#allocation33_spill]] %s2300_s16 }
   0xe   :  { %22 = vsyncpa [#allocation5], 0 }
   0xf   :  { %24 = vsyncpa [#allocation5 + $0x1], 0  ;;  %s1957_s21 = smov 0   ;;  %s1959_s22 = smov 0  }
  0x10   :  { %s1961_s23 = smov 0   ;;  %s1963_s24 = smov 0  }
  0x11   :  { %s1965_s25 = smov 0   ;;  %s1967_s26 = smov 0  }
  0x12   :  { %s1969_s27 = smov 0   ;;  %s1971_s28 = smov 0  }
  0x13 LB: > { %2330 = sst [smem:[#allocation7_spill]] %s1826_s21  ;;  %s1550_s29 = sadd.s32 4294967295, %s1854_s28   ;;  %s1854_s28 = sphi %s1971_s28, %s30_s28   ;;  %s1850_s27 = sphi %s1969_s27, %s2391_s27   ;;  %s1846_s26 = sphi %s1967_s26, %s2390_s26   ;;  %s1842_s25 = sphi %s1965_s25, %s2389_s25   ;;  %s1838_s24 = sphi %s1963_s24, %s2388_s24   ;;  %s1834_s23 = sphi %s1961_s23, %s2387_s23   ;;  %s1830_s22 = sphi %s1959_s22, %s2386_s22   ;;  %s1826_s21 = sphi %s1957_s21, %s2385_s21  }
  0x14   : > { %2331 = sst [smem:[#allocation8_spill]] %s1830_s22  ;;  %s1551_s30 = sadd.s32 4294967294, %s1854_s28  }
  0x15   : > { %2332 = sst [smem:[#allocation9_spill]] %s1834_s23  ;;  %s39_s0 = sadd.s32 1, %s1846_s26 }
  0x16   : > { %2333 = sst [smem:[#allocation10_spill]] %s1838_s24  ;;  %p40_p0 = scmp.ge.s32.totalorder %s39_s0, 2 }
  0x17   : > { %2334 = sst [smem:[#allocation11_spill]] %s1842_s25  ;;  %s42_s17 = sadd.s32 1, %s1850_s27 }
  0x18   : > { %2335 = sst [smem:[#allocation12_spill]] %s1846_s26  ;;  %p444_p1 = scmp.ne.s32.totalorder %s1834_s23, %s1830_s22 }
  0x19   : > { %2336 = sst [smem:[#allocation13_spill]] %s1850_s27  ;;  %p445_p2 = scmp.eq.s32.totalorder %s1550_s29, 3 }
  0x1a   : > { %2337 = sst [smem:[#allocation14_spill]] %s1854_s28  ;;  %s2393_s0 = smov (%p40_p0, %s39_s0), 0 }
  0x1b   : > { %2338 = sst [smem:[#allocation15_spill]] %s2393_s0  ;;  %s2395_s17 = smov (!%p40_p0, %s42_s17), %s1850_s27 }
  0x1c   : > { %p2006_p3 = por %p445_p2, %p444_p1  ;;  %p450_p4 = scmp.ne.s32.totalorder %s1830_s22, %s1826_s21 }
  0x1d   : > { %p44_p5 = scmp.ge.s32.totalorder %s2395_s17, 2  ;;  %p451_p6 = scmp.eq.s32.totalorder %s1551_s30, 3 }
  0x1e   : > { %s2339_s18 = scalar_select %p2006_p3, 1, 0 }
  0x1f   : > { %p1554_p7 = scmp.ge.s32.totalorder %s1854_s28, 1  ;;  %p593_p8 = scmp.lt.s32.totalorder %s1854_s28, 5 }
  0x20   : > { %2340 = sst [smem:[#allocation16_spill]] %s2339_s18  ;;  %s2397_s17 = smov (%p44_p5, %s2395_s17), 0 }
  0x21   : > { %2341 = sst [smem:[#allocation17_spill]] %s2397_s17  ;;  %p2016_p9 = por %p451_p6, %p450_p4 }
  0x22   : > { %p594_p10 = pnand %p1554_p7, %p593_p8  ;;  %s431_s20 = ssub.s32 %s1850_s27, %s2397_s17 }
  0x23   : > { %s2342_s19 = scalar_select %p2016_p9, 1, 0 }
  0x24   : > { %s434_s29 = sadd.s32 1, %s1834_s23  ;;  %p432_p11 = scmp.eq.s32.totalorder %s431_s20, 0 }
  0x25   : > { %2343 = sst [smem:[#allocation18_spill]] %s2342_s19  ;;  %597 = sbr.rel (%p594_p10) target bundleno = 1980 (0x7bc), region = 80 }
  0x26   : > { %s2024_s0 = scalar_select %p432_p11, %s1834_s23, %s434_s29  }
  0x28   : > { %2344 = sst [smem:[#allocation19_spill]] %s2024_s0 }
  0x2a   : > { %s2304_s30 = sand.u32 1, %s1830_s22   ;;  %p698_p12 = scmp.lt.s32.totalorder %s1842_s25, 1 }
  0x2b   : > { %s2030_s26 = sshll.u32 %s2304_s30, 3  ;;  %p705_p13 = scmp.lt.s32.totalorder %s1838_s24, 1 }
  0x2c   : > { %s2034_s19 = scalar_select %p698_p12, %s1842_s25, 1 }
  0x2d   : > { %s2037_s20 = scalar_select %p705_p13, %s1838_s24, 1 }
  0x2e   : > { %s1556_s29 = sshll.u32 %s2034_s19, 3  ;;  %s2346_s21 = sld [smem:[#allocation21_spill]] }
  0x2f   : > { %s1629_s15 = sshll.u32 %s2037_s20, 4  ;;  %s2347_s3 = sld [smem:[#allocation24_spill]] }
  0x30   : > { %s2348_s5 = sld [smem:[#allocation25_spill]]  ;;  %s1565_s13 = sshll.u32 %s2037_s20, 2 }
  0x31   : > { %s2352_s9 = sld [smem:[#allocation28_spill]]  ;;  %s755_s14 = sadd.s32 %s1565_s13, %s1556_s29 }
  0x32   : > { %s2356_s27 = sld [smem:[#allocation33_spill]]  ;;  %s686_s23 = scalar_lea.vmem [#allocation4], %s2030_s26 }
  0x34   : > { %s701_s28 = scalar_lea.vmem %s2346_s21, %s1556_s29  ;;  %s2357_s21 = sld [smem:[#allocation10_spill]] }
  0x35   : > { %s709_s25 = scalar_lea.vmem %s2347_s3, %s1629_s15  ;;  %s2354_s3 = sld [smem:[#allocation30_spill]] }
  0x36   : > { %s2058_s17 = scalar_lea.vmem %s2348_s5, %s1629_s15  ;;  %s1567_s5 = sshll.u32 %s755_s14, 3 }
  0x37   : > { %2349 = sst [smem:[#allocation20_spill]] %s2058_s17  ;;  %s2075_s16 = scalar_lea.vmem %s2352_s9, %s1629_s15 }
  0x38   : > { %s1632_s17 = sshll.u32 %s2037_s20, 5  ;;  %s2355_s9 = sld [smem:[#allocation31_spill]] }
  0x39   : > { %s2089_s2 = scalar_lea.vmem %s2295_s11, %s1632_s17  ;;  %s2103_s30 = scalar_lea.vmem %s2356_s27, %s1567_s5 }
  0x3a   : > { %p1568_p0 = scmp.ne.s32.totalorder %s2357_s21, 0 }
  0x3b   : > { %s745_s1 = scalar_lea.vmem %s2354_s3, %s2037_s20  ;;  %s2358_s3 = sld [smem:[#allocation22_spill]] (!%p1568_p0) }
  0x3c   : > { %762 = sbr.rel (%p1568_p0) target bundleno = 71 (0x47), region = 84 }
  0x3e   : > { %s748_s8 = scalar_lea.vmem %s2355_s9, %s2037_s20 }
  0x41   : > { %v763_v0 = vld [vmem:[%s701_s28] sm:$0xff]  ;;  %vm767_vm0 = vcmask 261120  }
  0x42   : > { %v765_v1 = vld [vmem:[%s2358_s3] sm:$0xff]  ;;  %v764_v2 = vmul.f32 5.656854, %v763_v0 }
  0x44   : > { %v766_v3 = vadd.f32 %v765_v1, %v764_v2 }
  0x46   : > { %768 = vst.msk [vmem:[#allocation2] sm:$0xff] %vm767_vm0, %v766_v3 }
  0x47 PF: > { %v1634_v4 = vld [vmem:[%s709_s25 + $0x8] sm:$0xff]  ;;  %v1633_v5 = vld [vmem:[%s709_s25] sm:$0xff]  ;;  %vm791_vm1 = vcmask 261120   ;;  %s2359_s9 = scalar_lea.vmem %s2288_s4, %s2037_s20  ;;  %s1856_s10 = smov 104   ;;  %vm814_vm2 = vcmask 64512   ;;  %v1863_v25 = vmov 0  }
  0x48   : > { %801 = vmatpush.bf16.msra.mxu0 %v1634_v4  ;;  %v1730_v8 = vld [vmem:[%s2359_s9] ss:$0 sm:$0xff]  ;;  %s1857_s25 = smov 120   ;;  %s1858_s28 = smov 96   ;;  %vm856_vm5 = vcmask 1043456   ;;  %vm874_vm6 = vcmask 60416  }
  0x49   : > { %s1859_s29 = smov 80   ;;  %s1860_s22 = smov 72   ;;  %vm940_vm7 = vcmask 126016   ;;  %vm1006_vm8 = vcmask 191616   ;;  %vm1072_vm9 = vcmask 257216   ;;  %vm1226_vm14 = vcmask 523264  }
  0x4a   : > { %s1861_s18 = smov 88   ;;  %s1862_s15 = smov 112  }
  0x4b   : > { %s2360_s14 = sld [smem:[#allocation23_spill]]  ;;  %s1865_s21 = smov 40  }
  0x4c   : > { %802 = vmatpush.bf16.msra.mxu0 %v1633_v5  ;;  %s1866_s17 = smov 56   ;;  %s1867_s0 = smov 48  }
  0x4d   : > { %v2110_v6 = vld [vmem:[#allocation2] sm:$0xff]  ;;  %s2364_s3 = sld [smem:[#allocation20_spill]]  ;;  %s1869_s5 = smov 16  }
  0x4e   : > { %v770_v7 = vpack.c.bf16 %v2110_v6, %v2110_v6  ;;  %s1870_s7 = smov 24   ;;  %s2368_s24 = sld [smem:[#allocation27_spill]] }
  0x50   : > { %1577 = vmatmul.msk.bf16.vlgmr.msra.gmra.mxu0 %vm791_vm1, %v770_v7 }
  0x51   : > { %s2361_s27 = scalar_lea.vmem %s2360_s14, %s2034_s19  ;;  %s1864_s19 = smov 64  }
  0x52   : > { %v808_v24 = vld [vmem:[%s2361_s27] sm:$0x1] }
  0x53   : > { %vm809_vm3 = vcmp.ne.s32.totalorder %v808_v24, 0 }
  0x54   : > { %v834_v26 = vsel %vm809_vm3, 1, %v1863_v25  ;;  %s2369_s13 = scalar_lea.vmem %s2368_s24, %s2037_s20 }
  0x55   : > { %v835_v27 = vperm.slane %v834_v26, 0 }
  0x57   : > { %vm2143_vm4 = vcmp.eq.s32.totalorder %v835_v27, 1 }
  0xcd   : > { %v804_v9 = vpop.f32.mrf.mxu0 }
  0xce   : > { %v805_v10 = vadd.f32 %v1730_v8, %v804_v9 }
  0xd0   : > { %v2120_v11 = vpack.c.bf16 %v805_v10, %v805_v10 }
  0xd2   : > { %1008 = vrot.lane.b32.xlu2 %v2120_v11, %s1856_s10  ;;  %876 = vrot.lane.b32.xlu1 %v2120_v11, %s1857_s25  ;;  %s2365_s25 = scalar_lea.vmem %s2290_s6, %s2037_s20 }
  0xd3   : > { %812 = vrot.lane.b32.xlu0 %v2120_v11, %s1858_s28 }
  0xd5   : > { %v806_v12 = vpop.f32.mrf.mxu0 }
  0xda   : > { %944 = vrot.lane.b32.xlu2 %v2120_v11, %s1859_s29  ;;  %1010 = vrot.lane.b32.xlu1 %v2120_v11, %s1860_s22  ;;  %s2366_s29 = sld [smem:[#allocation26_spill]] }
  0xdb   : > { %878 = vrot.lane.b32.xlu0 %v2120_v11, %s1861_s18 }
  0xe0   : > { %s2367_s22 = scalar_lea.vmem %s2366_s29, %s2037_s20 }
  0xe3   : > { %942 = vrot.lane.b32.xlu0 %v2120_v11, %s1862_s15 }
 0x12c   : > { %v1009_v13 = vpop.permute.xlu2 %1008 }
 0x134   : > { %v945_v14 = vpop.permute.xlu2 %944 }
 0x135   : > { %v950_v15 = vsel %vm814_vm2, %v945_v14, 0 }
 0x136   : > { %959 = vmatpush.bf16.xpose.msrb.mxu0 %v950_v15 }
 0x144   : > { %v877_v16 = vpop.permute.xlu1 %876 }
 0x145   : > { %v813_v17 = vpop.permute.xlu0 %812 }
 0x146   : > { %v819_v18 = vsel %vm814_vm2, %v813_v17, 0 }
 0x147   : > { %828 = vmatpush.bf16.xpose.msra.mxu1 %v819_v18 }
 0x14c   : > { %v1011_v19 = vpop.permute.xlu1 %1010 }
 0x14d   : > { %v879_v20 = vpop.permute.xlu0 %878  ;;  %v1016_v21 = vsel %vm814_vm2, %v1011_v19, 0 }
 0x14e   : > { %1578 = vmatmul.msk.bf16.vlgmr.msra.gmra.mxu1 %vm814_vm2, %v2120_v11  ;;  %v884_v22 = vsel %vm814_vm2, %v879_v20, 0 }
 0x14f   : > { %893 = vmatpush.bf16.xpose.msra.mxu3 %v884_v22 }
 0x155   : > { %v943_v23 = vpop.permute.xlu0 %942 }
 0x156   : > { %1580 = vmatmul.msk.bf16.vlgmr.msra.gmra.mxu3 %vm814_vm2, %v877_v16  ;;  %1583 = vmatmul.msk.bf16.vlgmr.msrb.gmra.mxu0 %vm814_vm2, %v943_v23 }
 0x157   : > { %1025 = vmatpush.bf16.xpose.msrb.mxu3 %v1016_v21 }
 0x166   : > { %1586 = vmatmul.msk.bf16.vlgmr.msrb.gmra.mxu3 %vm814_vm2, %v1009_v13 }
 0x1cb   : > { %v830_v29 = vpop.f32.mrf.mxu1 }
 0x1cc   : > { %v837_v30 = vsel %vm2143_vm4, 1e-10, %v830_v29 }
 0x1cd   : > { %v838_v31 = vsel %vm814_vm2, %v837_v30, -inf }
 0x1ce   : > { %839 = vmax.xlane.f32.xlu1 %v838_v31 }
 0x1d3   : > { %v832_v32 = vpop.f32.mrf.mxu1  ;;  %v961_v33 = vpop.f32.mrf.mxu0 }
 0x1d4   : > { %v965_v38 = vsel %vm2143_vm4, 1e-10, %v961_v33 }
 0x1d5   : > { %v966_v40 = vsel %vm814_vm2, %v965_v38, -inf }
 0x1d9   : > { %v895_v34 = vpop.f32.mrf.mxu3 }
 0x1da   : > { %v899_v35 = vsel %vm2143_vm4, 1e-10, %v895_v34 }
 0x1db   : > { %v963_v36 = vpop.f32.mrf.mxu0  ;;  %v900_v37 = vsel %vm814_vm2, %v899_v35, -inf }
 0x1dc   : > { %901 = vmax.xlane.f32.xlu2 %v900_v37 }
 0x1e1   : > { %v897_v39 = vpop.f32.mrf.mxu3 }
 0x1e2   : > { %v1635_v39 = vld [vmem:[%s2364_s3] sm:$0xff] }
 0x1e4   : > { %967 = vmax.xlane.f32.xlu2 %v966_v40 }
 0x1e9   : > { %v1027_v41 = vpop.f32.mrf.mxu3 }
 0x1ea   : > { %v1031_v42 = vsel %vm2143_vm4, 1e-10, %v1027_v41 }
 0x1eb   : > { %v1032_v43 = vsel %vm814_vm2, %v1031_v42, -inf }
 0x1ec   : > { %1033 = vmax.xlane.f32.xlu0 %v1032_v43 }
 0x1f1   : > { %v1029_v44 = vpop.f32.mrf.mxu3 }
 0x1f2   : > { %v1731_v44 = vld [vmem:[%s2365_s25] ss:$0 sm:$0xff]  ;;  %s2375_s25 = sld [smem:[#allocation10_spill]] }
 0x1f8   : > { %p1624_p1 = scmp.ne.s32.totalorder %s2375_s25, 1 }
 0x1fc   : > { %851 = vrot.lane.b32.xlu2 %v2120_v11, %s1864_s19  ;;  %s2370_s19 = sld [smem:[#allocation29_spill]] }
 0x204   : > { %1046 = vrot.lane.b32.xlu2 %v2120_v11, %s1865_s21  ;;  %s2371_s21 = scalar_lea.vmem %s2370_s19, %s2037_s20 }
 0x241   : > { %v840_v45 = vpop.xlane.xlu1 %839 }
 0x242   : > { %v841_v46 = vsub.f32 %v837_v30, %v840_v45 }
 0x244   : > { %v842_v47 = vmul.f32 1.442695, %v841_v46 }
 0x246   : > { %1738 = vpow2.f32 %v842_v47 }
 0x24c   : > { %v1739_v48 = vpop.eup %1738 }
 0x24d   : > { %v844_v49 = vsel %vm814_vm2, %v1739_v48, 0.0 }
 0x24e   : > { %845 = vadd.xlane.f32.xlu1 %v844_v49 }
 0x24f   : > { %v902_v50 = vpop.xlane.xlu2 %901 }
 0x250   : > { %v903_v53 = vsub.f32 %v899_v35, %v902_v50  ;;  %v1871_v50 = vmov 32.0  }
 0x252   : > { %v904_v55 = vmul.f32 1.442695, %v903_v53 }
 0x257   : > { %v968_v51 = vpop.xlane.xlu2 %967 }
 0x258   : > { %v969_v52 = vsub.f32 %v965_v38, %v968_v51  ;;  %v1636_v38 = vld [vmem:[%s2364_s3 + $0x8] sm:$0xff]  ;;  %s2372_s3 = scalar_lea.vmem %s2296_s12, %s2037_s20 }
 0x259   : > { %1104 = vmatpush.bf16.msra.mxu0 %v1636_v38 }
 0x25a   : > { %v970_v54 = vmul.f32 1.442695, %v969_v52 }
 0x25c   : > { %1740 = vpow2.f32 %v970_v54 }
 0x25d   : > { %1742 = vpow2.f32 %v904_v55  ;;  %1105 = vmatpush.bf16.msra.mxu0 %v1635_v39 }
 0x25f   : > { %v852_v56 = vpop.permute.xlu2 %851  ;;  %v1034_v57 = vpop.xlane.xlu0 %1033 }
 0x260   : > { %v858_v58 = vsel %vm856_vm5, %v852_v56, 0  ;;  %v1035_v60 = vsub.f32 %v1031_v42, %v1034_v57 }
 0x261   : > { %867 = vmatpush.bf16.msra.mxu2 %v858_v58 }
 0x262   : > { %v1741_v59 = vpop.eup %1740  ;;  %v1036_v62 = vmul.f32 1.442695, %v1035_v60 }
 0x263   : > { %v972_v61 = vsel %vm814_vm2, %v1741_v59, 0.0  ;;  %v1743_v63 = vpop.eup %1742 }
 0x264   : > { %973 = vadd.xlane.f32.xlu0 %v972_v61  ;;  %1744 = vpow2.f32 %v1036_v62  ;;  %v906_v0 = vsel %vm814_vm2, %v1743_v63, 0.0  ;;  %v1638_v61 = vld [vmem:[%s2075_s16 + $0x8] sm:$0xff]  ;;  %v1637_v62 = vld [vmem:[%s2075_s16] sm:$0xff] }
 0x267   : > { %914 = vrot.lane.b32.xlu1 %v2120_v11, %s1866_s17  ;;  %v1047_v9 = vpop.permute.xlu2 %1046 }
 0x268   : > { %v1052_v13 = vsel %vm856_vm5, %v1047_v9, 0 }
 0x26a   : > { %v1745_v1 = vpop.eup %1744 }
 0x26b   : > { %v1038_v2 = vsel %vm814_vm2, %v1745_v1, 0.0 }
 0x26c   : > { %907 = vadd.xlane.f32.xlu0 %v906_v0 }
 0x274   : > { %1039 = vadd.xlane.f32.xlu0 %v1038_v2  ;;  %v1641_v2 = vld [vmem:[%s2089_s2 + $0x10] sm:$0xff] }
 0x288   : > { %980 = vrot.lane.b32.xlu0 %v2120_v11, %s1867_s0 }
 0x2c1   : > { %v846_v3 = vpop.xlane.xlu1 %845 }
 0x2c2   : > { %1746 = vrcp.f32 %v846_v3 }
 0x2c8   : > { %v1747_v4 = vpop.eup %1746 }
 0x2c9   : > { %v848_v5 = vmul.f32 %v1747_v4, %v1739_v48  ;;  %v1640_v4 = vld [vmem:[%s2089_s2 + $0x8] sm:$0xff] }
 0x2cb   : > { %849 = vst.msk [vmem:[%s2103_s30] sm:$0xff] %vm814_vm2, %v848_v5  ;;  %v850_v7 = vpack.c.bf16 %v848_v5, %v848_v5 }
 0x2cd   : > { %1579 = vmatmul.msk.bf16.vlgmr.msra.gmra.mxu2 %vm814_vm2, %v850_v7 }
 0x2d7   : > { %v974_v8 = vpop.xlane.xlu0 %973 }
 0x2d8   : > { %1748 = vrcp.f32 %v974_v8 }
 0x2d9   : > { %v915_v10 = vpop.permute.xlu1 %914 }
 0x2da   : > { %v920_v12 = vsel %vm856_vm5, %v915_v10, 0 }
 0x2db   : > { %929 = vmatpush.bf16.msrb.mxu2 %v920_v12 }
 0x2de   : > { %v1749_v11 = vpop.eup %1748 }
 0x2df   : > { %1061 = vmatpush.bf16.msra.mxu2 %v1052_v13  ;;  %v976_v14 = vmul.f32 %v1749_v11, %v1741_v59  ;;  %v908_v15 = vpop.xlane.xlu0 %907  ;;  %v1732_v13 = vld [vmem:[%s2367_s22] ss:$0 sm:$0xff] }
 0x2e0   : > { %1750 = vrcp.f32 %v908_v15 }
 0x2e1   : > { %1584 = vst.msk [vmem:[%s2103_s30 + $0x10] sm:$0xff] %vm814_vm2, %v976_v14  ;;  %v979_v25 = vpack.c.bf16 %v976_v14, %v976_v14  ;;  %v1733_v14 = vld [vmem:[%s2369_s13] ss:$0 sm:$0xff] }
 0x2e6   : > { %v1751_v16 = vpop.eup %1750 }
 0x2e7   : > { %v910_v17 = vmul.f32 %v1751_v16, %v1743_v63  ;;  %v1040_v18 = vpop.xlane.xlu0 %1039  ;;  %v1642_v63 = vld [vmem:[%s2089_s2 + $0x18] sm:$0xff] }
 0x2e8   : > { %1752 = vrcp.f32 %v1040_v18  ;;  %1234 = vmatpush.bf16.msra.mxu3 %v1642_v63 }
 0x2e9   : > { %1581 = vst.msk [vmem:[%s2103_s30 + $0x8] sm:$0xff] %vm814_vm2, %v910_v17  ;;  %v913_v19 = vpack.c.bf16 %v910_v17, %v910_v17  ;;  %1754 = vrcp.f32 %v1871_v50 }
 0x2eb   : > { %1582 = vmatmul.msk.bf16.vlgmr.msrb.gmra.mxu2 %vm814_vm2, %v913_v19  ;;  %v1639_v19 = vld [vmem:[%s2089_s2] sm:$0xff] }
 0x2ec   : > { %1235 = vmatpush.bf16.msra.mxu3 %v1641_v2 }
 0x2ee   : > { %v1753_v20 = vpop.eup %1752 }
 0x2ef   : > { %v1042_v21 = vmul.f32 %v1753_v20, %v1745_v1  ;;  %v1755_v51 = vpop.eup %1754  ;;  %v1734_v20 = vld [vmem:[%s2371_s21] ss:$0 sm:$0xff] }
 0x2f0   : > { %v1116_v52 = vmul.f32 32.0, %v1755_v51  ;;  %vm1120_vm10 = vweird.f32 %v1755_v51  ;;  %1236 = vmatpush.bf16.msra.mxu3 %v1640_v4 }
 0x2f1   : > { %1587 = vst.msk [vmem:[%s2103_s30 + $0x18] sm:$0xff] %vm814_vm2, %v1042_v21  ;;  %v1045_v22 = vpack.c.bf16 %v1042_v21, %v1042_v21  ;;  %s1868_s30 = smov 8  }
 0x2f2   : > { %v1117_v53 = vsub.f32 1.0, %v1116_v52 }
 0x2f4   : > { %v1118_v54 = vmul.f32 %v1755_v51, %v1117_v53  ;;  %1237 = vmatpush.bf16.msra.mxu3 %v1639_v19 }
 0x2f6   : > { %v1119_v55 = vadd.f32 %v1755_v51, %v1118_v54 }
 0x2f8   : > { %v1121_v56 = vsel %vm1120_vm10, %v1755_v51, %v1119_v55 }
 0x2fa   : > { %v981_v23 = vpop.permute.xlu0 %980 }
 0x2fb   : > { %1588 = vmatmul.msk.bf16.vlgmr.msra.gmra.mxu2 %vm814_vm2, %v1045_v22  ;;  %v986_v24 = vsel %vm856_vm5, %v981_v23, 0 }
 0x2fc   : > { %995 = vmatpush.bf16.msrb.mxu1 %v986_v24 }
 0x2ff   : > { %1585 = vmatmul.msk.bf16.vlgmr.msrb.gmra.mxu1 %vm814_vm2, %v979_v25 }
 0x300   : > { %1181 = vmatpush.bf16.msra.mxu1 %v1638_v61 }
 0x304   : > { %1182 = vmatpush.bf16.msra.mxu1 %v1637_v62 }
 0x350   : > { %v869_v26 = vpop.f32.mrf.mxu2 }
 0x351   : > { %v873_v27 = vpack.c.bf16 %v869_v26, %v869_v26  ;;  %v1735_v26 = vld [vmem:[%s2372_s3] ss:$0 sm:$0xff] }
 0x353   : > { %875 = vst.msk [vmem:[#allocation3] sm:$0xf] %vm874_vm6, %v873_v27 }
 0x358   : > { %v871_v28 = vpop.f32.mrf.mxu2 }
 0x36e   : > { %v931_v29 = vpop.f32.mrf.mxu2 }
 0x36f   : > { %v935_v30 = vpack.c.bf16 %v931_v29, %v931_v29 }
 0x371   : > { %937 = vrot.lane.b32.xlu1 %v935_v30, %s1868_s30 }
 0x376   : > { %v933_v31 = vpop.f32.mrf.mxu2 }
 0x37c   : > { %v997_v32 = vpop.f32.mrf.mxu1 }
 0x37d   : > { %v1001_v33 = vpack.c.bf16 %v997_v32, %v997_v32 }
 0x37e   : > { %v1063_v34 = vpop.f32.mrf.mxu2 }
 0x37f   : > { %v1067_v35 = vpack.c.bf16 %v1063_v34, %v1063_v34  ;;  %1003 = vrot.lane.b32.xlu2 %v1001_v33, %s1869_s5 }
 0x381   : > { %1069 = vrot.lane.b32.xlu1 %v1067_v35, %s1870_s7 }
 0x384   : > { %v999_v36 = vpop.f32.mrf.mxu1 }
 0x386   : > { %v1065_v37 = vpop.f32.mrf.mxu2 }
 0x3d9   : > { %v1004_v41 = vpop.permute.xlu2 %1003 }
 0x3e3   : > { %v938_v40 = vpop.permute.xlu1 %937 }
 0x3e4   : > { %941 = vst.msk [vmem:[#allocation3] sm:$0xf] %vm940_vm7, %v938_v40 }
 0x3e5   : > { %1007 = vst.msk [vmem:[#allocation3] sm:$0xf] %vm1006_vm8, %v1004_v41 }
 0x3f3   : > { %v1070_v42 = vpop.permute.xlu1 %1069 }
 0x3f4   : > { %1073 = vst.msk [vmem:[#allocation3] sm:$0xf] %vm1072_vm9, %v1070_v42 }
 0x3fb   : > { %v1074_v43 = vld [vmem:[#allocation3] sm:$0xf] }
 0x3fc   : > { %1597 = vmatmul.msk.bf16.vlgmr.msra.gmra.mxu0 %vm791_vm1, %v1074_v43 }
 0x479   : > { %v1107_v45 = vpop.f32.mrf.mxu0 }
 0x47a   : > { %v1108_v46 = vadd.f32 %v1731_v44, %v1107_v45 }
 0x47c   : > { %v1111_v47 = vadd.f32 %v1108_v46, %v2110_v6  ;;  %v1736_v46 = vld [vmem:[%s745_s1] ss:$0 sm:$0xff] }
 0x47e   : > { %v1112_v48 = vsel %vm791_vm1, %v1111_v47, 0.0 }
 0x47f   : > { %1113 = vadd.xlane.f32.xlu2 %v1112_v48  ;;  %v1737_v48 = vld [vmem:[%s748_s8] ss:$0 sm:$0xff] }
 0x481   : > { %v1109_v49 = vpop.f32.mrf.mxu0 }
 0x4f2   : > { %v1114_v57 = vpop.xlane.xlu2 %1113 }
 0x4f3   : > { %v1122_v58 = vmul.f32 %v1121_v56, %v1114_v57 }
 0x4f5   : > { %v1123_v6 = vsub.f32 %v1111_v47, %v1122_v58 }
 0x4f7   : > { %v1124_v59 = vmul.f32 %v1123_v6, %v1123_v6 }
 0x4f9   : > { %v1125_v60 = vsel %vm791_vm1, %v1124_v59, 0.0 }
 0x4fa   : > { %1126 = vadd.xlane.f32.xlu1 %v1125_v60 }
 0x56d   : > { %v1127_v0 = vpop.xlane.xlu1 %1126 }
 0x56e   : > { %v1128_v1 = vmul.f32 %v1127_v0, %v1121_v56 }
 0x570   : > { %v1129_v3 = vadd.f32 1e-05, %v1128_v1 }
 0x572   : > { %1756 = vrsqrt.f32 %v1129_v3  ;;  %vm1136_vm12 = vweird.f32 %v1129_v3 }
 0x578   : > { %v1757_v5 = vpop.eup %1756 }
 0x579   : > { %v1131_v7 = vmul.f32 %v1757_v5, %v1129_v3  ;;  %vm1137_vm11 = vweird.f32 %v1757_v5 }
 0x57a   : > { %vm1138_vm13 = vmor %vm1136_vm12, %vm1137_vm11 }
 0x57b   : > { %v1132_v8 = vmul.f32 %v1757_v5, %v1131_v7 }
 0x57d   : > { %v1133_v9 = vmul.f32 0.5, %v1132_v8 }
 0x57f   : > { %v1134_v10 = vsub.f32 1.5, %v1133_v9 }
 0x581   : > { %v1135_v12 = vmul.f32 %v1757_v5, %v1134_v10 }
 0x583   : > { %v1139_v11 = vsel %vm1138_vm13, %v1757_v5, %v1135_v12 }
 0x584   : > { %v1140_v15 = vmul.f32 %v1139_v11, %v1123_v6 }
 0x586   : > { %v1145_v16 = vmul.f32 %v1732_v13, %v1140_v15 }
 0x588   : > { %v1150_v17 = vadd.f32 %v1733_v14, %v1145_v16 }
 0x58a   : > { %v1151_v18 = vpack.c.bf16 %v1150_v17, %v1150_v17 }
 0x58c   : > { %1606 = vmatmul.msk.bf16.vlgmr.msra.gmra.mxu1 %vm791_vm1, %v1151_v18 }
 0x609   : > { %v1184_v21 = vpop.f32.mrf.mxu1 }
 0x60a   : > { %v1185_v22 = vadd.f32 %v1734_v20, %v1184_v21 }
 0x60c   : > { %v1188_v23 = vmax.f32 %v1185_v22, 0.0 }
 0x60e   : > { %v1189_v24 = vpack.c.bf16 %v1188_v23, %v1188_v23 }
 0x610   : > { %1623 = vmatmul.msk.bf16.vlgmr.msra.gmra.mxu3 %vm1226_vm14, %v1189_v24 }
 0x611   : > { %v1186_v25 = vpop.f32.mrf.mxu1 }
 0x693   : > { %v1239_v27 = vpop.f32.mrf.mxu3 }
 0x694   : > { %v1240_v28 = vadd.f32 %v1735_v26, %v1239_v27 }
 0x696   : > { %v1243_v29 = vadd.f32 %v1240_v28, %v1150_v17 }
 0x698   : > { %v1244_v30 = vsel %vm791_vm1, %v1243_v29, 0.0 }
 0x699   : > { %1245 = vadd.xlane.f32.xlu0 %v1244_v30 }
 0x69b   : > { %v1241_v31 = vpop.f32.mrf.mxu3 }
 0x70c   : > { %v1246_v32 = vpop.xlane.xlu0 %1245 }
 0x70d   : > { %v1247_v33 = vmul.f32 %v1246_v32, %v1121_v56 }
 0x70f   : > { %v1248_v34 = vsub.f32 %v1243_v29, %v1247_v33 }
 0x711   : > { %v1249_v35 = vmul.f32 %v1248_v34, %v1248_v34 }
 0x713   : > { %v1250_v36 = vsel %vm791_vm1, %v1249_v35, 0.0 }
 0x714   : > { %1251 = vadd.xlane.f32.xlu2 %v1250_v36 }
 0x787   : > { %v1252_v37 = vpop.xlane.xlu2 %1251 }
 0x788   : > { %v1253_v38 = vmul.f32 %v1252_v37, %v1121_v56 }
 0x78a   : > { %v1254_v39 = vadd.f32 1e-05, %v1253_v38 }
 0x78c   : > { %1758 = vrsqrt.f32 %v1254_v39  ;;  %vm1261_vm0 = vweird.f32 %v1254_v39 }
 0x792   : > { %v1759_v40 = vpop.eup %1758 }
 0x793   : > { %v1256_v41 = vmul.f32 %v1759_v40, %v1254_v39  ;;  %vm1262_vm15 = vweird.f32 %v1759_v40 }
 0x794   : > { %vm1263_vm2 = vmor %vm1261_vm0, %vm1262_vm15 }
 0x795   : > { %v1257_v42 = vmul.f32 %v1759_v40, %v1256_v41 }
 0x797   : > { %v1258_v43 = vmul.f32 0.5, %v1257_v42 }
 0x799   : > { %v1259_v44 = vsub.f32 1.5, %v1258_v43 }
 0x79b   : > { %v1260_v45 = vmul.f32 %v1759_v40, %v1259_v44 }
 0x79d   : > { %v1264_v47 = vsel %vm1263_vm2, %v1759_v40, %v1260_v45 }
 0x79e   : > { %v1265_v49 = vmul.f32 %v1264_v47, %v1248_v34 }
 0x7a0   : > { %v1270_v50 = vmul.f32 %v1736_v46, %v1265_v49  ;;  %1280 = sbr.rel (%p1624_p1) target bundleno = 1958 (0x7a6), region = 88 }
 0x7a2   : > { %v1275_v51 = vadd.f32 %v1737_v48, %v1270_v50 }
 0x7a4   : > { %1276 = vst.msk [vmem:[#allocation2] sm:$0xff] %vm791_vm1, %v1275_v51 }
 0x7a5   : > { %1281 = vst.msk [vmem:[%s686_s23] sm:$0xff] %vm791_vm1, %v1275_v51 }
 0x7a6 PF: > { %s2376_s1 = sld [smem:[#allocation11_spill]]  ;;  %s1304_s24 = sshll.u32 %s686_s23, 4  ;;  %s1305_s24 = int_to_ptr.vmem [resolvable:$true] %s1304_s24 }
 0x7a7   : > { %s2377_s16 = sld [smem:[#allocation8_spill]] }
 0x7a8   : > { %s2379_s22 = sld [smem:[#allocation32_spill]] }
 0x7ac   : > { %s1626_s29 = sshll.u32 %s2376_s1, 3 }
 0x7ad   : > { %s2381_s14 = sand.u32 1, %s2377_s16  }
 0x7ae   : > { %s2380_s18 = smov %s2379_s22  ;;  %s1302_s15 = scalar_lea.hbm %s2379_s22, %s1626_s29 }
 0x7af   : > { %s1306_s13 = sshll.u32 %s1302_s15, 4  ;;  %s1283_s27 = scalar_lea.sflag [#allocation5], %s2381_s14  ;;  %s1307_s13 = int_to_ptr.hbm [resolvable:$true] %s1306_s13 }
 0x7b0   : > { %s1774_s19 = sshra.s32 %s1307_s13, 4  ;;  %s1780_s3 = scalar_lea.hbm %s2380_s18, 16  ;;  %s1775_s19 = int_to_ptr.hbm [resolvable:$true] %s1774_s19 }
 0x7b1   : > { %s1776_s21 = scalar_lea.hbm %s1775_s19, 8  ;;  %p1781_p6 = scmp.lt.s32.totalorder %s1775_s19, %s2380_s18 }
 0x7b2   : > { %p1777_p2 = scmp.ne.s32.totalorder %s1775_s19, %s1776_s21  ;;  %p1782_p7 = scmp.lt.s32.totalorder %s1780_s3, %s1776_s21 }
 0x7b4   : > { %p1778_p4 = pnand %p1777_p2, %p2006_p3  ;;  %p1783_p8 = por %p1782_p7, %p1781_p6 }
 0x7b6   : > { %p1779_p5 = pneg %p1778_p4 }
 0x7b8   : > { %p1784_p10 = pnand %p1783_p8, %p1779_p5 }
 0x7ba   : > { %1787 = shalt.err (!%p1784_p10)
}
 0x7bb   : > { %1643 = dma.vmem_to_hbm [thread:$0]  (%p2006_p3), %s1305_s24, 128, %s1307_s13, %s1283_s27  }
 0x7bc PF: > { %s2382_s26 = sld [smem:[#allocation14_spill]] }
 0x7bd   : > { %s2383_s23 = sld [smem:[#allocation7_spill]] }
 0x7c2   : > { %p1649_p11 = scmp.ge.s32.totalorder %s2382_s26, 2 }
 0x7c3   : > { %s1321_s7 = sand.u32 1, %s2383_s23  }
 0x7c4   : > { %p1646_p12 = pnand %p1649_p11, %p2016_p9  ;;  %s1322_s9 = scalar_lea.sflag [#allocation5], %s1321_s7 }
 0x7c6   : > { %p1647_p13 = pneg %p1646_p12 }
 0x7c8   : > { %1821 = dma.done.wait (%p1647_p13), %s1322_s9, 128  }
 0x7c9   : > { %1823 = vsyncadd (%p1647_p13), %s1322_s9, 4294967168  ;;  %s30_s28 = sadd.s32 1, %s2382_s26   ;;  %s2385_s21 = sld [smem:[#allocation8_spill]] }
 0x7ca   : > { %p27_p0 = scmp.ge.s32.totalorder %s30_s28, 6   ;;  %s2386_s22 = sld [smem:[#allocation9_spill]] }
 0x7cb   : > { %s2387_s23 = sld [smem:[#allocation19_spill]] }
 0x7cc   : > { %s2388_s24 = sld [smem:[#allocation12_spill]]  ;;  %29 = sbr.rel (!%p27_p0) target bundleno = 19 (0x13), region = 177 }
 0x7cd   : > { %s2389_s25 = sld [smem:[#allocation13_spill]] }
 0x7ce   : > { %s2390_s26 = sld [smem:[#allocation15_spill]] }
 0x7cf   : > { %s2391_s27 = sld [smem:[#allocation17_spill]] }
 0x7d1   :  { %1340 = vsyncpa [#allocation5], 1 }
 0x7d2   :  { %1342 = vsyncpa [#allocation5 + $0x1], 1 }

</bundles_post_ra>
